<compile_context>
chip_gen: v5e
topology: v5e:2x2
jax: 0.10.0
libtpu: 0.0.40
codegen_flags: <defaults>
</compile_context>

<pallas_src>
import math

import numpy as np
import jax
import jax.numpy as jnp
from jax import lax
from jax.experimental import pallas as pl
from jax.experimental.pallas import tpu as pltpu

# ----------------------------- config ("TaskConfig") -------------------------
VOCAB = 20        # token vocabulary
VOCAB_PAD = 32    # embedding table padded to a sublane multiple for the MXU
D = 32            # encoder / decoder hidden dim
N_HEADS = 2       # attention heads
DH = D // N_HEADS
CONV_H = 64       # FFT-block conv hidden dim
MELS = 16         # output_linear.mels
N_ENC_LAYERS = 1
N_DEC_LAYERS = 1
LN_EPS = 1e-5

T_TOK = 8         # token sequence length used in the demo
MAX_DUR = 3       # max duration per token used in the demo
MAX_MEL_LEN = T_TOK * MAX_DUR   # static decoder length (no host sync / recompile)

MXU_DTYPE = jnp.bfloat16        # MXU operand dtype; accumulation stays f32
WEIGHTS_PER_LAYER = 12


# ------------------------------- kernel helpers -------------------------------
def _mxu_dot(a, b):
    # bf16 operands, f32 accumulation on the MXU.
    return jnp.dot(a.astype(MXU_DTYPE), b.astype(MXU_DTYPE),
                   preferred_element_type=jnp.float32)


def _ln(x, g, b):
    mu = jnp.mean(x, axis=-1, keepdims=True)
    var = jnp.mean(jnp.square(x - mu), axis=-1, keepdims=True)
    return (x - mu) * lax.rsqrt(var + LN_EPS) * g + b


def _shift_mats(T):
    # (s_prev @ x)[t] = x[t-1] (row 0 -> 0),  (s_next @ x)[t] = x[t+1] (last row -> 0).
    row = lax.broadcasted_iota(jnp.int32, (T, T), 0)
    col = lax.broadcasted_iota(jnp.int32, (T, T), 1)
    s_prev = (row == col + 1).astype(jnp.float32)
    s_next = (row + 1 == col).astype(jnp.float32)
    return s_prev, s_next


def _fft_block(x, lrefs, mask_row=None, mask_col=None):
    """One FFT block on VMEM-resident values.  x: [T, D] f32."""
    (wqkv, bqkv, wo, bo, ln1g, ln1b,
     c1w, c1b, c2w, c2b, ln2g, ln2b) = lrefs
    T, Dm = x.shape

    # ---- packed QKV projection (softmax scale pre-folded into Q cols / bq) ----
    qkv = _mxu_dot(x, wqkv[...]) + bqkv[...]                       # [T, 3D]

    if mask_row is not None:
        # hoisted out of the head loop (JAX does not CSE broadcasts)
        bias = jnp.broadcast_to((mask_row - 1.0) * 1e9, (T, T))    # 0 valid / -1e9 pad

    # ---- multi-head attention; per-head accumulation through wo (no concat) ----
    o = None
    for h in range(N_HEADS):
        qh = qkv[:, h * DH:(h + 1) * DH]
        kh = qkv[:, Dm + h * DH:Dm + (h + 1) * DH]
        vh = qkv[:, 2 * Dm + h * DH:2 * Dm + (h + 1) * DH]
        # q @ k^T without an explicit transpose (contract last dims).
        s = lax.dot_general(qh.astype(MXU_DTYPE), kh.astype(MXU_DTYPE),
                            (((1,), (1,)), ((), ())),
                            preferred_element_type=jnp.float32)    # [T, T]
        if mask_row is not None:
            s = s + bias
        smax = jnp.max(s, axis=-1, keepdims=True)
        p = jnp.exp(s - smax)
        denom = jnp.sum(p, axis=-1, keepdims=True)
        p = p * pl.reciprocal(denom, approx=True)
        ctx = _mxu_dot(p, vh)                                      # [T, DH]
        contrib = _mxu_dot(ctx, wo[h * DH:(h + 1) * DH, :])        # [T, D]
        o = contrib if o is None else o + contrib
    o = o + bo[...]

    h1 = _ln(x + o, ln1g[...], ln1b[...])                          # [T, D]
    # zero padded frames before the k=3 conv (parity with dynamic-length ref)
    h1m = h1 * mask_col if mask_col is not None else h1

    # ---- conv1 / conv2 (k=3, same pad) via shift-matrix matmuls (MXU is idle) ----
    s_prev, s_next = _shift_mats(T)
    xp = jnp.dot(s_prev, h1m, preferred_element_type=jnp.float32)
    xn = jnp.dot(s_next, h1m, preferred_element_type=jnp.float32)
    c1 = (_mxu_dot(xp, c1w[0]) + _mxu_dot(h1m, c1w[1]) + _mxu_dot(xn, c1w[2])
          + c1b[...])
    c1 = jnp.maximum(c1, 0.0)                                      # [T, CONV_H]
    if mask_col is not None:
        c1 = c1 * mask_col
    c1p = jnp.dot(s_prev, c1, preferred_element_type=jnp.float32)
    c1n = jnp.dot(s_next, c1, preferred_element_type=jnp.float32)
    c2 = (_mxu_dot(c1p, c2w[0]) + _mxu_dot(c1, c2w[1]) + _mxu_dot(c1n, c2w[2])
          + c2b[...])                                              # [T, D]

    h2 = _ln(h1 + c2, ln2g[...], ln2b[...])
    if mask_col is not None:
        h2 = h2 * mask_col
    return h2


# ------------------------------- the fused kernel ------------------------------
def _fastspeech_kernel(*refs):
    # refs = (tok, dur, emb, pos_tok, pos_mel,
    #         12*N_ENC_LAYERS enc weights, 12*N_DEC_LAYERS dec weights,
    #         out_wT, out_b, mel_out)
    tok_ref, dur_ref, emb_ref, pos_tok_ref, pos_mel_ref = refs[:5]
    idx = 5
    enc_layers = []
    for _ in range(N_ENC_LAYERS):
        enc_layers.append(refs[idx:idx + WEIGHTS_PER_LAYER])
        idx += WEIGHTS_PER_LAYER
    dec_layers = []
    for _ in range(N_DEC_LAYERS):
        dec_layers.append(refs[idx:idx + WEIGHTS_PER_LAYER])
        idx += WEIGHTS_PER_LAYER
    out_wT_ref, out_b_ref = refs[idx:idx + 2]
    mel_ref = refs[idx + 2]

    L = pos_mel_ref.shape[0]

    # ---- encoder: embedding gather as one-hot matmul + pos enc + FFT blocks ----
    tok = tok_ref[0]                                               # [T_TOK, 1] int32
    oh = (lax.broadcasted_iota(jnp.int32, (T_TOK, VOCAB_PAD), 1) == tok
          ).astype(jnp.float32)                                    # [T_TOK, VOCAB_PAD]
    x = (jnp.dot(oh, emb_ref[...], preferred_element_type=jnp.float32)
         + pos_tok_ref[...])                                       # [T_TOK, D]
    for lrefs in enc_layers:
        x = _fft_block(x, lrefs)                                   # no padding on tokens

    # ---- length regulator: one-hot expand matrix from duration cumsums ----
    dur = dur_ref[0]                                               # [T_TOK, 1] int32
    srow = lax.broadcasted_iota(jnp.int32, (T_TOK, T_TOK), 0)
    scol = lax.broadcasted_iota(jnp.int32, (T_TOK, T_TOK), 1)
    cum_end = jnp.sum(dur * (srow <= scol).astype(jnp.int32),
                      axis=0, keepdims=True)                       # [1, T_TOK]
    cum_start = jnp.sum(dur * (srow < scol).astype(jnp.int32),
                        axis=0, keepdims=True)                     # [1, T_TOK]
    total = jnp.sum(dur, keepdims=True)                            # [1, 1]
    frames = lax.broadcasted_iota(jnp.int32, (L, T_TOK), 0)
    expand = jnp.logical_and(frames >= cum_start, frames < cum_end
                             ).astype(jnp.float32)                 # [L, T_TOK]
    xd = jnp.dot(expand, x, preferred_element_type=jnp.float32)    # [L, D] exact copy

    mask_col = (lax.broadcasted_iota(jnp.int32, (L, 1), 0) < total
                ).astype(jnp.float32)                              # [L, 1]
    mask_row = (lax.broadcasted_iota(jnp.int32, (1, L), 1) < total
                ).astype(jnp.float32)                              # [1, L]

    # ---- decoder ----
    xd = (xd + pos_mel_ref[...]) * mask_col
    for lrefs in dec_layers:
        xd = _fft_block(xd, lrefs, mask_row=mask_row, mask_col=mask_col)

    # ---- fused mel projection + .transpose(-2,-1) + frame masking ----
    mel_t = lax.dot_general(out_wT_ref[...], xd.astype(MXU_DTYPE),
                            (((1,), (1,)), ((), ())),
                            preferred_element_type=jnp.float32)    # [MELS, L]
    mel_ref[0] = (mel_t + out_b_ref[...]) * mask_row


# ------------------------------- param packing --------------------------------
def sinusoid_pos_enc(T, Dm):
    pos = np.arange(T)[:, None].astype(np.float32)
    i = np.arange(Dm)[None, :].astype(np.float32)
    angle = pos / np.power(10000.0, (2.0 * (i // 2)) / Dm)
    pe = np.where((np.arange(Dm)[None, :] % 2) == 0, np.sin(angle), np.cos(angle))
    return jnp.asarray(pe, dtype=jnp.float32)


def prepare_params(p):
    """One-time packing of weights into kernel-ready arrays (runs once, not per forward)."""
    scale = 1.0 / math.sqrt(DH)
    emb_pad = jnp.zeros((VOCAB_PAD, D), jnp.float32).at[:VOCAB].set(p["emb"])
    packed = [emb_pad, sinusoid_pos_enc(T_TOK, D), sinusoid_pos_enc(MAX_MEL_LEN, D)]
    for name, nl in (("enc", N_ENC_LAYERS), ("dec", N_DEC_LAYERS)):
        for l in range(nl):
            pre = f"{name}{l}"
            # 1/sqrt(dh) folded into the Q columns and bq.
            wqkv = jnp.concatenate(
                [p[f"{pre}_wq"] * scale, p[f"{pre}_wk"], p[f"{pre}_wv"]],
                axis=1).astype(MXU_DTYPE)
            bqkv = jnp.concatenate(
                [p[f"{pre}_bq"] * scale, p[f"{pre}_bk"], p[f"{pre}_bv"]]
            ).reshape(1, 3 * D)
            packed += [
                wqkv, bqkv,
                p[f"{pre}_wo"].astype(MXU_DTYPE), p[f"{pre}_bo"].reshape(1, D),
                p[f"{pre}_ln1_g"].reshape(1, D), p[f"{pre}_ln1_b"].reshape(1, D),
                p[f"{pre}_conv1_w"].astype(MXU_DTYPE), p[f"{pre}_conv1_b"].reshape(1, CONV_H),
                p[f"{pre}_conv2_w"].astype(MXU_DTYPE), p[f"{pre}_conv2_b"].reshape(1, D),
                p[f"{pre}_ln2_g"].reshape(1, D), p[f"{pre}_ln2_b"].reshape(1, D),
            ]
    packed += [p["out_w"].T.astype(MXU_DTYPE), p["out_b"].reshape(MELS, 1)]
    return tuple(packed)


# ------------------------------- forward ---------------------------------------
def fastspeech_forward(packed, tokens, durations):
    B = tokens.shape[0]
    lengths = jnp.sum(durations, axis=-1)
    tok3 = tokens.reshape(B, T_TOK, 1)
    dur3 = durations.reshape(B, T_TOK, 1)

    def row_spec(shape):
        nd = len(shape)
        return pl.BlockSpec((1,) + tuple(shape[1:]),
                            lambda i, nd=nd: (i,) + (0,) * (nd - 1))

    def const_spec(arr):
        nd = arr.ndim
        return pl.BlockSpec(tuple(arr.shape), lambda i, nd=nd: (0,) * nd)

    in_specs = ([row_spec(tok3.shape), row_spec(dur3.shape)]
                + [const_spec(a) for a in packed])

    mel = pl.pallas_call(
        _fastspeech_kernel,
        grid=(B,),
        in_specs=in_specs,
        out_specs=pl.BlockSpec((1, MELS, MAX_MEL_LEN), lambda i: (i, 0, 0)),
        out_shape=jax.ShapeDtypeStruct((B, MELS, MAX_MEL_LEN), jnp.float32),
        compiler_params=pltpu.CompilerParams(dimension_semantics=("parallel",)),
    )(tok3, dur3, *packed)

    # TODO(synk): a dynamic-max-length reference would slice mel to the batch max
    # length (shape-dynamic); here padded columns are zeroed at static MAX_MEL_LEN.
    return lengths, mel


# ------------------------------- init ----------------------------------------
def init_params(key):
    keys = iter(jax.random.split(key, 128))
    p = {}
    p["emb"] = jax.random.normal(next(keys), (VOCAB, D), jnp.float32) * 0.02
    for name, nlayers in (("enc", N_ENC_LAYERS), ("dec", N_DEC_LAYERS)):
        for l in range(nlayers):
            pre = f"{name}{l}"
            for w in ("q", "k", "v", "o"):
                p[f"{pre}_w{w}"] = jax.random.normal(next(keys), (D, D), jnp.float32) * 0.02
                p[f"{pre}_b{w}"] = jnp.zeros((D,), jnp.float32)
            p[f"{pre}_ln1_g"] = jnp.ones((D,), jnp.float32)
            p[f"{pre}_ln1_b"] = jnp.zeros((D,), jnp.float32)
            p[f"{pre}_conv1_w"] = jax.random.normal(next(keys), (3, D, CONV_H), jnp.float32) * 0.02
            p[f"{pre}_conv1_b"] = jnp.zeros((CONV_H,), jnp.float32)
            p[f"{pre}_conv2_w"] = jax.random.normal(next(keys), (3, CONV_H, D), jnp.float32) * 0.02
            p[f"{pre}_conv2_b"] = jnp.zeros((D,), jnp.float32)
            p[f"{pre}_ln2_g"] = jnp.ones((D,), jnp.float32)
            p[f"{pre}_ln2_b"] = jnp.zeros((D,), jnp.float32)
    p["out_w"] = jax.random.normal(next(keys), (D, MELS), jnp.float32) * 0.02
    p["out_b"] = jnp.zeros((MELS,), jnp.float32)
    return p


# ------------------------------- main -----------------------------------------
if __name__ == "__main__":
    key = jax.random.PRNGKey(0)
    k_params, k_tok, k_dur = jax.random.split(key, 3)

    B = 2
    params = init_params(k_params)
    packed = prepare_params(params)   # one-time packing (review: hoist out of forward)
    tokens = jax.random.randint(k_tok, (B, T_TOK), 1, VOCAB, dtype=jnp.int32)
    durations = jax.random.randint(k_dur, (B, T_TOK), 1, MAX_DUR + 1, dtype=jnp.int32)

    fwd = jax.jit(fastspeech_forward)   # static shapes everywhere -> single compile
    lengths, mel = fwd(packed, tokens, durations)
    lengths = jax.block_until_ready(lengths)
    mel = jax.block_until_ready(mel)

    assert mel.shape == (B, MELS, MAX_MEL_LEN)
    assert int(jax.device_get(jnp.max(lengths))) <= MAX_MEL_LEN
    assert bool(jnp.all(jnp.isfinite(mel)))
    print("KERNEL_OK")
</pallas_src>

<mosaic_0001>
module attributes {stable_mosaic.version = 11 : i64} {
  func.func @_fastspeech_kernel(%arg0: i32, %arg1: memref<1x8x1xi32, #tpu.memory_space<vmem>>, %arg2: memref<1x8x1xi32, #tpu.memory_space<vmem>>, %arg3: memref<32x32xf32, #tpu.memory_space<vmem>>, %arg4: memref<8x32xf32, #tpu.memory_space<vmem>>, %arg5: memref<24x32xf32, #tpu.memory_space<vmem>>, %arg6: memref<32x96xbf16, #tpu.memory_space<vmem>>, %arg7: memref<1x96xf32, #tpu.memory_space<vmem>>, %arg8: memref<32x32xbf16, #tpu.memory_space<vmem>>, %arg9: memref<1x32xf32, #tpu.memory_space<vmem>>, %arg10: memref<1x32xf32, #tpu.memory_space<vmem>>, %arg11: memref<1x32xf32, #tpu.memory_space<vmem>>, %arg12: memref<3x32x64xbf16, #tpu.memory_space<vmem>>, %arg13: memref<1x64xf32, #tpu.memory_space<vmem>>, %arg14: memref<3x64x32xbf16, #tpu.memory_space<vmem>>, %arg15: memref<1x32xf32, #tpu.memory_space<vmem>>, %arg16: memref<1x32xf32, #tpu.memory_space<vmem>>, %arg17: memref<1x32xf32, #tpu.memory_space<vmem>>, %arg18: memref<32x96xbf16, #tpu.memory_space<vmem>>, %arg19: memref<1x96xf32, #tpu.memory_space<vmem>>, %arg20: memref<32x32xbf16, #tpu.memory_space<vmem>>, %arg21: memref<1x32xf32, #tpu.memory_space<vmem>>, %arg22: memref<1x32xf32, #tpu.memory_space<vmem>>, %arg23: memref<1x32xf32, #tpu.memory_space<vmem>>, %arg24: memref<3x32x64xbf16, #tpu.memory_space<vmem>>, %arg25: memref<1x64xf32, #tpu.memory_space<vmem>>, %arg26: memref<3x64x32xbf16, #tpu.memory_space<vmem>>, %arg27: memref<1x32xf32, #tpu.memory_space<vmem>>, %arg28: memref<1x32xf32, #tpu.memory_space<vmem>>, %arg29: memref<1x32xf32, #tpu.memory_space<vmem>>, %arg30: memref<16x32xbf16, #tpu.memory_space<vmem>>, %arg31: memref<16x1xf32, #tpu.memory_space<vmem>>, %arg32: memref<1x16x24xf32, #tpu.memory_space<vmem>>) attributes {dimension_semantics = [#tpu.dimension_semantics<parallel>], iteration_bounds = array<i64: 2>, scalar_prefetch = 0 : i64, scratch_operands = 0 : i64, tpu.core_type = #tpu.core_type<tc>, window_params = [{transform_indices = @transform_0, window_bounds = array<i64: 1, 8, 1>}, {transform_indices = @transform_1, window_bounds = array<i64: 1, 8, 1>}, {pipeline_mode = #tpu.pipeline_mode<synchronous>, transform_indices = @transform_2, window_bounds = array<i64: 32, 32>}, {pipeline_mode = #tpu.pipeline_mode<synchronous>, transform_indices = @transform_3, window_bounds = array<i64: 8, 32>}, {pipeline_mode = #tpu.pipeline_mode<synchronous>, transform_indices = @transform_4, window_bounds = array<i64: 24, 32>}, {pipeline_mode = #tpu.pipeline_mode<synchronous>, transform_indices = @transform_5, window_bounds = array<i64: 32, 96>}, {pipeline_mode = #tpu.pipeline_mode<synchronous>, transform_indices = @transform_6, window_bounds = array<i64: 1, 96>}, {pipeline_mode = #tpu.pipeline_mode<synchronous>, transform_indices = @transform_7, window_bounds = array<i64: 32, 32>}, {pipeline_mode = #tpu.pipeline_mode<synchronous>, transform_indices = @transform_8, window_bounds = array<i64: 1, 32>}, {pipeline_mode = #tpu.pipeline_mode<synchronous>, transform_indices = @transform_9, window_bounds = array<i64: 1, 32>}, {pipeline_mode = #tpu.pipeline_mode<synchronous>, transform_indices = @transform_10, window_bounds = array<i64: 1, 32>}, {pipeline_mode = #tpu.pipeline_mode<synchronous>, transform_indices = @transform_11, window_bounds = array<i64: 3, 32, 64>}, {pipeline_mode = #tpu.pipeline_mode<synchronous>, transform_indices = @transform_12, window_bounds = array<i64: 1, 64>}, {pipeline_mode = #tpu.pipeline_mode<synchronous>, transform_indices = @transform_13, window_bounds = array<i64: 3, 64, 32>}, {pipeline_mode = #tpu.pipeline_mode<synchronous>, transform_indices = @transform_14, window_bounds = array<i64: 1, 32>}, {pipeline_mode = #tpu.pipeline_mode<synchronous>, transform_indices = @transform_15, window_bounds = array<i64: 1, 32>}, {pipeline_mode = #tpu.pipeline_mode<synchronous>, transform_indices = @transform_16, window_bounds = array<i64: 1, 32>}, {pipeline_mode = #tpu.pipeline_mode<synchronous>, transform_indices = @transform_17, window_bounds = array<i64: 32, 96>}, {pipeline_mode = #tpu.pipeline_mode<synchronous>, transform_indices = @transform_18, window_bounds = array<i64: 1, 96>}, {pipeline_mode = #tpu.pipeline_mode<synchronous>, transform_indices = @transform_19, window_bounds = array<i64: 32, 32>}, {pipeline_mode = #tpu.pipeline_mode<synchronous>, transform_indices = @transform_20, window_bounds = array<i64: 1, 32>}, {pipeline_mode = #tpu.pipeline_mode<synchronous>, transform_indices = @transform_21, window_bounds = array<i64: 1, 32>}, {pipeline_mode = #tpu.pipeline_mode<synchronous>, transform_indices = @transform_22, window_bounds = array<i64: 1, 32>}, {pipeline_mode = #tpu.pipeline_mode<synchronous>, transform_indices = @transform_23, window_bounds = array<i64: 3, 32, 64>}, {pipeline_mode = #tpu.pipeline_mode<synchronous>, transform_indices = @transform_24, window_bounds = array<i64: 1, 64>}, {pipeline_mode = #tpu.pipeline_mode<synchronous>, transform_indices = @transform_25, window_bounds = array<i64: 3, 64, 32>}, {pipeline_mode = #tpu.pipeline_mode<synchronous>, transform_indices = @transform_26, window_bounds = array<i64: 1, 32>}, {pipeline_mode = #tpu.pipeline_mode<synchronous>, transform_indices = @transform_27, window_bounds = array<i64: 1, 32>}, {pipeline_mode = #tpu.pipeline_mode<synchronous>, transform_indices = @transform_28, window_bounds = array<i64: 1, 32>}, {pipeline_mode = #tpu.pipeline_mode<synchronous>, transform_indices = @transform_29, window_bounds = array<i64: 16, 32>}, {pipeline_mode = #tpu.pipeline_mode<synchronous>, transform_indices = @transform_30, window_bounds = array<i64: 16, 1>}, {transform_indices = @transform_31, window_bounds = array<i64: 1, 16, 24>}]} {
    %c0 = arith.constant 0 : index
    %c0_0 = arith.constant 0 : index
    %c0_1 = arith.constant 0 : index
    %0 = vector.load %arg1[%c0, %c0_0, %c0_1] : memref<1x8x1xi32, #tpu.memory_space<vmem>>, vector<1x8x1xi32>
    %1 = vector.shape_cast %0 : vector<1x8x1xi32> to vector<8x1xi32>
    %2 = tpu.iota {dimensions = array<i32: 1>} : vector<8x32xi32>
    %3 = vector.broadcast %1 : vector<8x1xi32> to vector<8x32xi32>
    %4 = arith.cmpi eq, %2, %3 : vector<8x32xi32>
    %5 = arith.extui %4 : vector<8x32xi1> to vector<8x32xi32>
    %6 = arith.sitofp %5 : vector<8x32xi32> to vector<8x32xf32>
    %c0_2 = arith.constant 0 : index
    %c0_3 = arith.constant 0 : index
    %7 = vector.load %arg3[%c0_2, %c0_3] : memref<32x32xf32, #tpu.memory_space<vmem>>, vector<32x32xf32>
    %cst = arith.constant dense<0.000000e+00> : vector<8x32xf32>
    %8 = tpu.matmul %6, %7, %cst {dimension_numbers = #tpu.dot_dimension_numbers<[1], [0], [0], [1], [0, 0, 1, 1], [], []>} : vector<8x32xf32>, vector<32x32xf32>, vector<8x32xf32> -> vector<8x32xf32>
    %c0_4 = arith.constant 0 : index
    %c0_5 = arith.constant 0 : index
    %9 = vector.load %arg4[%c0_4, %c0_5] : memref<8x32xf32, #tpu.memory_space<vmem>>, vector<8x32xf32>
    %10 = arith.addf %8, %9 : vector<8x32xf32>
    %c0_6 = arith.constant 0 : index
    %c0_7 = arith.constant 0 : index
    %11 = vector.load %arg6[%c0_6, %c0_7] : memref<32x96xbf16, #tpu.memory_space<vmem>>, vector<32x96xbf16>
    %12 = arith.truncf %10 : vector<8x32xf32> to vector<8x32xbf16>
    %cst_8 = arith.constant dense<0.000000e+00> : vector<8x96xf32>
    %13 = tpu.matmul %12, %11, %cst_8 {dimension_numbers = #tpu.dot_dimension_numbers<[1], [0], [0], [1], [0, 0, 1, 1], [], []>} : vector<8x32xbf16>, vector<32x96xbf16>, vector<8x96xf32> -> vector<8x96xf32>
    %c0_9 = arith.constant 0 : index
    %c0_10 = arith.constant 0 : index
    %14 = vector.load %arg7[%c0_9, %c0_10] : memref<1x96xf32, #tpu.memory_space<vmem>>, vector<1x96xf32>
    %15 = vector.broadcast %14 : vector<1x96xf32> to vector<8x96xf32>
    %16 = arith.addf %13, %15 : vector<8x96xf32>
    %17 = vector.extract_strided_slice %16 {offsets = [0, 0], sizes = [8, 16], strides = [1, 1]} : vector<8x96xf32> to vector<8x16xf32>
    %18 = vector.extract_strided_slice %16 {offsets = [0, 32], sizes = [8, 16], strides = [1, 1]} : vector<8x96xf32> to vector<8x16xf32>
    %19 = vector.extract_strided_slice %16 {offsets = [0, 64], sizes = [8, 16], strides = [1, 1]} : vector<8x96xf32> to vector<8x16xf32>
    %20 = arith.truncf %17 : vector<8x16xf32> to vector<8x16xbf16>
    %21 = arith.truncf %18 : vector<8x16xf32> to vector<8x16xbf16>
    %cst_11 = arith.constant dense<0.000000e+00> : vector<8x8xf32>
    %22 = tpu.matmul %20, %21, %cst_11 {dimension_numbers = #tpu.dot_dimension_numbers<[1], [1], [0], [0], [0, 0, 1, 0], [], []>} : vector<8x16xbf16>, vector<8x16xbf16>, vector<8x8xf32> -> vector<8x8xf32>
    %cst_12 = arith.constant dense<0xFF800000> : vector<8xf32>
    %23 = vector.multi_reduction <maximumf>, %22, %cst_12 [1] : vector<8x8xf32> to vector<8xf32>
    %24 = vector.shape_cast %23 : vector<8xf32> to vector<8x1xf32>
    %25 = vector.broadcast %24 : vector<8x1xf32> to vector<8x8xf32>
    %26 = arith.subf %22, %25 : vector<8x8xf32>
    %27 = math.exp %26 : vector<8x8xf32>
    %cst_13 = arith.constant dense<0.000000e+00> : vector<8xf32>
    %28 = vector.multi_reduction <add>, %27, %cst_13 [1] : vector<8x8xf32> to vector<8xf32>
    %29 = vector.shape_cast %28 : vector<8xf32> to vector<8x1xf32>
    %30 = tpu.reciprocal %29 {approx = true} : vector<8x1xf32> -> vector<8x1xf32>
    %31 = vector.broadcast %30 : vector<8x1xf32> to vector<8x8xf32>
    %32 = arith.mulf %27, %31 : vector<8x8xf32>
    %33 = arith.truncf %32 : vector<8x8xf32> to vector<8x8xbf16>
    %34 = arith.truncf %19 : vector<8x16xf32> to vector<8x16xbf16>
    %cst_14 = arith.constant dense<0.000000e+00> : vector<8x16xf32>
    %35 = tpu.matmul %33, %34, %cst_14 {dimension_numbers = #tpu.dot_dimension_numbers<[1], [0], [0], [1], [0, 0, 1, 1], [], []>} : vector<8x8xbf16>, vector<8x16xbf16>, vector<8x16xf32> -> vector<8x16xf32>
    %c0_15 = arith.constant 0 : index
    %c0_16 = arith.constant 0 : index
    %36 = vector.load %arg8[%c0_15, %c0_16] : memref<32x32xbf16, #tpu.memory_space<vmem>>, vector<16x32xbf16>
    %37 = arith.truncf %35 : vector<8x16xf32> to vector<8x16xbf16>
    %cst_17 = arith.constant dense<0.000000e+00> : vector<8x32xf32>
    %38 = tpu.matmul %37, %36, %cst_17 {dimension_numbers = #tpu.dot_dimension_numbers<[1], [0], [0], [1], [0, 0, 1, 1], [], []>} : vector<8x16xbf16>, vector<16x32xbf16>, vector<8x32xf32> -> vector<8x32xf32>
    %39 = vector.extract_strided_slice %16 {offsets = [0, 16], sizes = [8, 16], strides = [1, 1]} : vector<8x96xf32> to vector<8x16xf32>
    %40 = vector.extract_strided_slice %16 {offsets = [0, 48], sizes = [8, 16], strides = [1, 1]} : vector<8x96xf32> to vector<8x16xf32>
    %41 = vector.extract_strided_slice %16 {offsets = [0, 80], sizes = [8, 16], strides = [1, 1]} : vector<8x96xf32> to vector<8x16xf32>
    %42 = arith.truncf %39 : vector<8x16xf32> to vector<8x16xbf16>
    %43 = arith.truncf %40 : vector<8x16xf32> to vector<8x16xbf16>
    %cst_18 = arith.constant dense<0.000000e+00> : vector<8x8xf32>
    %44 = tpu.matmul %42, %43, %cst_18 {dimension_numbers = #tpu.dot_dimension_numbers<[1], [1], [0], [0], [0, 0, 1, 0], [], []>} : vector<8x16xbf16>, vector<8x16xbf16>, vector<8x8xf32> -> vector<8x8xf32>
    %cst_19 = arith.constant dense<0xFF800000> : vector<8xf32>
    %45 = vector.multi_reduction <maximumf>, %44, %cst_19 [1] : vector<8x8xf32> to vector<8xf32>
    %46 = vector.shape_cast %45 : vector<8xf32> to vector<8x1xf32>
    %47 = vector.broadcast %46 : vector<8x1xf32> to vector<8x8xf32>
    %48 = arith.subf %44, %47 : vector<8x8xf32>
    %49 = math.exp %48 : vector<8x8xf32>
    %cst_20 = arith.constant dense<0.000000e+00> : vector<8xf32>
    %50 = vector.multi_reduction <add>, %49, %cst_20 [1] : vector<8x8xf32> to vector<8xf32>
    %51 = vector.shape_cast %50 : vector<8xf32> to vector<8x1xf32>
    %52 = tpu.reciprocal %51 {approx = true} : vector<8x1xf32> -> vector<8x1xf32>
    %53 = vector.broadcast %52 : vector<8x1xf32> to vector<8x8xf32>
    %54 = arith.mulf %49, %53 : vector<8x8xf32>
    %55 = arith.truncf %54 : vector<8x8xf32> to vector<8x8xbf16>
    %56 = arith.truncf %41 : vector<8x16xf32> to vector<8x16xbf16>
    %cst_21 = arith.constant dense<0.000000e+00> : vector<8x16xf32>
    %57 = tpu.matmul %55, %56, %cst_21 {dimension_numbers = #tpu.dot_dimension_numbers<[1], [0], [0], [1], [0, 0, 1, 1], [], []>} : vector<8x8xbf16>, vector<8x16xbf16>, vector<8x16xf32> -> vector<8x16xf32>
    %c16 = arith.constant 16 : index
    %c0_22 = arith.constant 0 : index
    %58 = vector.load %arg8[%c16, %c0_22] : memref<32x32xbf16, #tpu.memory_space<vmem>>, vector<16x32xbf16>
    %59 = arith.truncf %57 : vector<8x16xf32> to vector<8x16xbf16>
    %cst_23 = arith.constant dense<0.000000e+00> : vector<8x32xf32>
    %60 = tpu.matmul %59, %58, %cst_23 {dimension_numbers = #tpu.dot_dimension_numbers<[1], [0], [0], [1], [0, 0, 1, 1], [], []>} : vector<8x16xbf16>, vector<16x32xbf16>, vector<8x32xf32> -> vector<8x32xf32>
    %61 = arith.addf %38, %60 : vector<8x32xf32>
    %c0_24 = arith.constant 0 : index
    %c0_25 = arith.constant 0 : index
    %62 = vector.load %arg9[%c0_24, %c0_25] : memref<1x32xf32, #tpu.memory_space<vmem>>, vector<1x32xf32>
    %63 = vector.broadcast %62 : vector<1x32xf32> to vector<8x32xf32>
    %64 = arith.addf %61, %63 : vector<8x32xf32>
    %65 = arith.addf %10, %64 : vector<8x32xf32>
    %c0_26 = arith.constant 0 : index
    %c0_27 = arith.constant 0 : index
    %66 = vector.load %arg10[%c0_26, %c0_27] : memref<1x32xf32, #tpu.memory_space<vmem>>, vector<1x32xf32>
    %c0_28 = arith.constant 0 : index
    %c0_29 = arith.constant 0 : index
    %67 = vector.load %arg11[%c0_28, %c0_29] : memref<1x32xf32, #tpu.memory_space<vmem>>, vector<1x32xf32>
    %cst_30 = arith.constant dense<0.000000e+00> : vector<8xf32>
    %68 = vector.multi_reduction <add>, %65, %cst_30 [1] : vector<8x32xf32> to vector<8xf32>
    %69 = vector.shape_cast %68 : vector<8xf32> to vector<8x1xf32>
    %cst_31 = arith.constant 3.200000e+01 : f32
    %70 = vector.broadcast %cst_31 : f32 to vector<8x1xf32>
    %71 = arith.divf %69, %70 : vector<8x1xf32>
    %72 = vector.broadcast %71 : vector<8x1xf32> to vector<8x32xf32>
    %73 = arith.subf %65, %72 : vector<8x32xf32>
    %74 = arith.mulf %73, %73 : vector<8x32xf32>
    %cst_32 = arith.constant dense<0.000000e+00> : vector<8xf32>
    %75 = vector.multi_reduction <add>, %74, %cst_32 [1] : vector<8x32xf32> to vector<8xf32>
    %76 = vector.shape_cast %75 : vector<8xf32> to vector<8x1xf32>
    %cst_33 = arith.constant 3.200000e+01 : f32
    %77 = vector.broadcast %cst_33 : f32 to vector<8x1xf32>
    %78 = arith.divf %76, %77 : vector<8x1xf32>
    %79 = vector.broadcast %71 : vector<8x1xf32> to vector<8x32xf32>
    %80 = arith.subf %65, %79 : vector<8x32xf32>
    %cst_34 = arith.constant 9.99999974E-6 : f32
    %81 = vector.broadcast %cst_34 : f32 to vector<8x1xf32>
    %82 = arith.addf %78, %81 : vector<8x1xf32>
    %83 = math.rsqrt %82 : vector<8x1xf32>
    %84 = vector.broadcast %83 : vector<8x1xf32> to vector<8x32xf32>
    %85 = arith.mulf %80, %84 : vector<8x32xf32>
    %86 = vector.broadcast %66 : vector<1x32xf32> to vector<8x32xf32>
    %87 = arith.mulf %85, %86 : vector<8x32xf32>
    %88 = vector.broadcast %67 : vector<1x32xf32> to vector<8x32xf32>
    %89 = arith.addf %87, %88 : vector<8x32xf32>
    %90 = tpu.iota {dimensions = array<i32: 0>} : vector<8x8xi32>
    %91 = tpu.iota {dimensions = array<i32: 1>} : vector<8x8xi32>
    %c1_i32 = arith.constant 1 : i32
    %92 = vector.broadcast %c1_i32 : i32 to vector<8x8xi32>
    %93 = arith.addi %91, %92 : vector<8x8xi32>
    %94 = arith.cmpi eq, %90, %93 : vector<8x8xi32>
    %95 = arith.extui %94 : vector<8x8xi1> to vector<8x8xi32>
    %96 = arith.sitofp %95 : vector<8x8xi32> to vector<8x8xf32>
    %c1_i32_35 = arith.constant 1 : i32
    %97 = vector.broadcast %c1_i32_35 : i32 to vector<8x8xi32>
    %98 = arith.addi %90, %97 : vector<8x8xi32>
    %99 = arith.cmpi eq, %98, %91 : vector<8x8xi32>
    %100 = arith.extui %99 : vector<8x8xi1> to vector<8x8xi32>
    %101 = arith.sitofp %100 : vector<8x8xi32> to vector<8x8xf32>
    %cst_36 = arith.constant dense<0.000000e+00> : vector<8x32xf32>
    %102 = tpu.matmul %96, %89, %cst_36 {dimension_numbers = #tpu.dot_dimension_numbers<[1], [0], [0], [1], [0, 0, 1, 1], [], []>} : vector<8x8xf32>, vector<8x32xf32>, vector<8x32xf32> -> vector<8x32xf32>
    %cst_37 = arith.constant dense<0.000000e+00> : vector<8x32xf32>
    %103 = tpu.matmul %101, %89, %cst_37 {dimension_numbers = #tpu.dot_dimension_numbers<[1], [0], [0], [1], [0, 0, 1, 1], [], []>} : vector<8x8xf32>, vector<8x32xf32>, vector<8x32xf32> -> vector<8x32xf32>
    %c0_38 = arith.constant 0 : index
    %c0_39 = arith.constant 0 : index
    %c0_40 = arith.constant 0 : index
    %104 = vector.load %arg12[%c0_38, %c0_39, %c0_40] : memref<3x32x64xbf16, #tpu.memory_space<vmem>>, vector<1x32x64xbf16>
    %105 = vector.shape_cast %104 : vector<1x32x64xbf16> to vector<32x64xbf16>
    %106 = arith.truncf %102 : vector<8x32xf32> to vector<8x32xbf16>
    %cst_41 = arith.constant dense<0.000000e+00> : vector<8x64xf32>
    %107 = tpu.matmul %106, %105, %cst_41 {dimension_numbers = #tpu.dot_dimension_numbers<[1], [0], [0], [1], [0, 0, 1, 1], [], []>} : vector<8x32xbf16>, vector<32x64xbf16>, vector<8x64xf32> -> vector<8x64xf32>
    %c1 = arith.constant 1 : index
    %c0_42 = arith.constant 0 : index
    %c0_43 = arith.constant 0 : index
    %108 = vector.load %arg12[%c1, %c0_42, %c0_43] : memref<3x32x64xbf16, #tpu.memory_space<vmem>>, vector<1x32x64xbf16>
    %109 = vector.shape_cast %108 : vector<1x32x64xbf16> to vector<32x64xbf16>
    %110 = arith.truncf %89 : vector<8x32xf32> to vector<8x32xbf16>
    %cst_44 = arith.constant dense<0.000000e+00> : vector<8x64xf32>
    %111 = tpu.matmul %110, %109, %cst_44 {dimension_numbers = #tpu.dot_dimension_numbers<[1], [0], [0], [1], [0, 0, 1, 1], [], []>} : vector<8x32xbf16>, vector<32x64xbf16>, vector<8x64xf32> -> vector<8x64xf32>
    %112 = arith.addf %107, %111 : vector<8x64xf32>
    %c2 = arith.constant 2 : index
    %c0_45 = arith.constant 0 : index
    %c0_46 = arith.constant 0 : index
    %113 = vector.load %arg12[%c2, %c0_45, %c0_46] : memref<3x32x64xbf16, #tpu.memory_space<vmem>>, vector<1x32x64xbf16>
    %114 = vector.shape_cast %113 : vector<1x32x64xbf16> to vector<32x64xbf16>
    %115 = arith.truncf %103 : vector<8x32xf32> to vector<8x32xbf16>
    %cst_47 = arith.constant dense<0.000000e+00> : vector<8x64xf32>
    %116 = tpu.matmul %115, %114, %cst_47 {dimension_numbers = #tpu.dot_dimension_numbers<[1], [0], [0], [1], [0, 0, 1, 1], [], []>} : vector<8x32xbf16>, vector<32x64xbf16>, vector<8x64xf32> -> vector<8x64xf32>
    %117 = arith.addf %112, %116 : vector<8x64xf32>
    %c0_48 = arith.constant 0 : index
    %c0_49 = arith.constant 0 : index
    %118 = vector.load %arg13[%c0_48, %c0_49] : memref<1x64xf32, #tpu.memory_space<vmem>>, vector<1x64xf32>
    %119 = vector.broadcast %118 : vector<1x64xf32> to vector<8x64xf32>
    %120 = arith.addf %117, %119 : vector<8x64xf32>
    %cst_50 = arith.constant 0.000000e+00 : f32
    %121 = vector.broadcast %cst_50 : f32 to vector<8x64xf32>
    %122 = arith.maximumf %120, %121 : vector<8x64xf32>
    %cst_51 = arith.constant dense<0.000000e+00> : vector<8x64xf32>
    %123 = tpu.matmul %96, %122, %cst_51 {dimension_numbers = #tpu.dot_dimension_numbers<[1], [0], [0], [1], [0, 0, 1, 1], [], []>} : vector<8x8xf32>, vector<8x64xf32>, vector<8x64xf32> -> vector<8x64xf32>
    %cst_52 = arith.constant dense<0.000000e+00> : vector<8x64xf32>
    %124 = tpu.matmul %101, %122, %cst_52 {dimension_numbers = #tpu.dot_dimension_numbers<[1], [0], [0], [1], [0, 0, 1, 1], [], []>} : vector<8x8xf32>, vector<8x64xf32>, vector<8x64xf32> -> vector<8x64xf32>
    %c0_53 = arith.constant 0 : index
    %c0_54 = arith.constant 0 : index
    %c0_55 = arith.constant 0 : index
    %125 = vector.load %arg14[%c0_53, %c0_54, %c0_55] : memref<3x64x32xbf16, #tpu.memory_space<vmem>>, vector<1x64x32xbf16>
    %126 = vector.shape_cast %125 : vector<1x64x32xbf16> to vector<64x32xbf16>
    %127 = arith.truncf %123 : vector<8x64xf32> to vector<8x64xbf16>
    %cst_56 = arith.constant dense<0.000000e+00> : vector<8x32xf32>
    %128 = tpu.matmul %127, %126, %cst_56 {dimension_numbers = #tpu.dot_dimension_numbers<[1], [0], [0], [1], [0, 0, 1, 1], [], []>} : vector<8x64xbf16>, vector<64x32xbf16>, vector<8x32xf32> -> vector<8x32xf32>
    %c1_57 = arith.constant 1 : index
    %c0_58 = arith.constant 0 : index
    %c0_59 = arith.constant 0 : index
    %129 = vector.load %arg14[%c1_57, %c0_58, %c0_59] : memref<3x64x32xbf16, #tpu.memory_space<vmem>>, vector<1x64x32xbf16>
    %130 = vector.shape_cast %129 : vector<1x64x32xbf16> to vector<64x32xbf16>
    %131 = arith.truncf %122 : vector<8x64xf32> to vector<8x64xbf16>
    %cst_60 = arith.constant dense<0.000000e+00> : vector<8x32xf32>
    %132 = tpu.matmul %131, %130, %cst_60 {dimension_numbers = #tpu.dot_dimension_numbers<[1], [0], [0], [1], [0, 0, 1, 1], [], []>} : vector<8x64xbf16>, vector<64x32xbf16>, vector<8x32xf32> -> vector<8x32xf32>
    %133 = arith.addf %128, %132 : vector<8x32xf32>
    %c2_61 = arith.constant 2 : index
    %c0_62 = arith.constant 0 : index
    %c0_63 = arith.constant 0 : index
    %134 = vector.load %arg14[%c2_61, %c0_62, %c0_63] : memref<3x64x32xbf16, #tpu.memory_space<vmem>>, vector<1x64x32xbf16>
    %135 = vector.shape_cast %134 : vector<1x64x32xbf16> to vector<64x32xbf16>
    %136 = arith.truncf %124 : vector<8x64xf32> to vector<8x64xbf16>
    %cst_64 = arith.constant dense<0.000000e+00> : vector<8x32xf32>
    %137 = tpu.matmul %136, %135, %cst_64 {dimension_numbers = #tpu.dot_dimension_numbers<[1], [0], [0], [1], [0, 0, 1, 1], [], []>} : vector<8x64xbf16>, vector<64x32xbf16>, vector<8x32xf32> -> vector<8x32xf32>
    %138 = arith.addf %133, %137 : vector<8x32xf32>
    %c0_65 = arith.constant 0 : index
    %c0_66 = arith.constant 0 : index
    %139 = vector.load %arg15[%c0_65, %c0_66] : memref<1x32xf32, #tpu.memory_space<vmem>>, vector<1x32xf32>
    %140 = vector.broadcast %139 : vector<1x32xf32> to vector<8x32xf32>
    %141 = arith.addf %138, %140 : vector<8x32xf32>
    %142 = arith.addf %89, %141 : vector<8x32xf32>
    %c0_67 = arith.constant 0 : index
    %c0_68 = arith.constant 0 : index
    %143 = vector.load %arg16[%c0_67, %c0_68] : memref<1x32xf32, #tpu.memory_space<vmem>>, vector<1x32xf32>
    %c0_69 = arith.constant 0 : index
    %c0_70 = arith.constant 0 : index
    %144 = vector.load %arg17[%c0_69, %c0_70] : memref<1x32xf32, #tpu.memory_space<vmem>>, vector<1x32xf32>
    %cst_71 = arith.constant dense<0.000000e+00> : vector<8xf32>
    %145 = vector.multi_reduction <add>, %142, %cst_71 [1] : vector<8x32xf32> to vector<8xf32>
    %146 = vector.shape_cast %145 : vector<8xf32> to vector<8x1xf32>
    %cst_72 = arith.constant 3.200000e+01 : f32
    %147 = vector.broadcast %cst_72 : f32 to vector<8x1xf32>
    %148 = arith.divf %146, %147 : vector<8x1xf32>
    %149 = vector.broadcast %148 : vector<8x1xf32> to vector<8x32xf32>
    %150 = arith.subf %142, %149 : vector<8x32xf32>
    %151 = arith.mulf %150, %150 : vector<8x32xf32>
    %cst_73 = arith.constant dense<0.000000e+00> : vector<8xf32>
    %152 = vector.multi_reduction <add>, %151, %cst_73 [1] : vector<8x32xf32> to vector<8xf32>
    %153 = vector.shape_cast %152 : vector<8xf32> to vector<8x1xf32>
    %cst_74 = arith.constant 3.200000e+01 : f32
    %154 = vector.broadcast %cst_74 : f32 to vector<8x1xf32>
    %155 = arith.divf %153, %154 : vector<8x1xf32>
    %156 = vector.broadcast %148 : vector<8x1xf32> to vector<8x32xf32>
    %157 = arith.subf %142, %156 : vector<8x32xf32>
    %cst_75 = arith.constant 9.99999974E-6 : f32
    %158 = vector.broadcast %cst_75 : f32 to vector<8x1xf32>
    %159 = arith.addf %155, %158 : vector<8x1xf32>
    %160 = math.rsqrt %159 : vector<8x1xf32>
    %161 = vector.broadcast %160 : vector<8x1xf32> to vector<8x32xf32>
    %162 = arith.mulf %157, %161 : vector<8x32xf32>
    %163 = vector.broadcast %143 : vector<1x32xf32> to vector<8x32xf32>
    %164 = arith.mulf %162, %163 : vector<8x32xf32>
    %165 = vector.broadcast %144 : vector<1x32xf32> to vector<8x32xf32>
    %166 = arith.addf %164, %165 : vector<8x32xf32>
    %c0_76 = arith.constant 0 : index
    %c0_77 = arith.constant 0 : index
    %c0_78 = arith.constant 0 : index
    %167 = vector.load %arg2[%c0_76, %c0_77, %c0_78] : memref<1x8x1xi32, #tpu.memory_space<vmem>>, vector<1x8x1xi32>
    %168 = vector.shape_cast %167 : vector<1x8x1xi32> to vector<8x1xi32>
    %169 = tpu.iota {dimensions = array<i32: 0>} : vector<8x8xi32>
    %170 = tpu.iota {dimensions = array<i32: 1>} : vector<8x8xi32>
    %171 = arith.cmpi sle, %169, %170 : vector<8x8xi32>
    %172 = arith.extui %171 : vector<8x8xi1> to vector<8x8xi32>
    %173 = vector.broadcast %168 : vector<8x1xi32> to vector<8x8xi32>
    %174 = arith.muli %173, %172 : vector<8x8xi32>
    %cst_79 = arith.constant dense<0> : vector<8xi32>
    %175 = vector.multi_reduction <add>, %174, %cst_79 [0] : vector<8x8xi32> to vector<8xi32>
    %176 = vector.shape_cast %175 : vector<8xi32> to vector<1x8xi32>
    %177 = arith.cmpi slt, %169, %170 : vector<8x8xi32>
    %178 = arith.extui %177 : vector<8x8xi1> to vector<8x8xi32>
    %179 = vector.broadcast %168 : vector<8x1xi32> to vector<8x8xi32>
    %180 = arith.muli %179, %178 : vector<8x8xi32>
    %cst_80 = arith.constant dense<0> : vector<8xi32>
    %181 = vector.multi_reduction <add>, %180, %cst_80 [0] : vector<8x8xi32> to vector<8xi32>
    %182 = vector.shape_cast %181 : vector<8xi32> to vector<1x8xi32>
    %183 = vector.shape_cast %168 : vector<8x1xi32> to vector<1x8x1xi32>
    %cst_81 = arith.constant dense<0> : vector<1xi32>
    %184 = vector.multi_reduction <add>, %183, %cst_81 [1, 2] : vector<1x8x1xi32> to vector<1xi32>
    %185 = vector.shape_cast %184 : vector<1xi32> to vector<1x1x1xi32>
    %186 = vector.extract %185[0, 0, 0] : i32 from vector<1x1x1xi32>
    %187 = vector.broadcast %186 : i32 to vector<1x1xi32>
    %188 = tpu.iota {dimensions = array<i32: 0>} : vector<24x8xi32>
    %189 = vector.broadcast %182 : vector<1x8xi32> to vector<24x8xi32>
    %190 = arith.cmpi sge, %188, %189 : vector<24x8xi32>
    %191 = vector.broadcast %176 : vector<1x8xi32> to vector<24x8xi32>
    %192 = arith.cmpi slt, %188, %191 : vector<24x8xi32>
    %193 = arith.andi %190, %192 : vector<24x8xi1>
    %194 = arith.extui %193 : vector<24x8xi1> to vector<24x8xi32>
    %195 = arith.sitofp %194 : vector<24x8xi32> to vector<24x8xf32>
    %cst_82 = arith.constant dense<0.000000e+00> : vector<24x32xf32>
    %196 = tpu.matmul %195, %166, %cst_82 {dimension_numbers = #tpu.dot_dimension_numbers<[1], [0], [0], [1], [0, 0, 1, 1], [], []>} : vector<24x8xf32>, vector<8x32xf32>, vector<24x32xf32> -> vector<24x32xf32>
    %197 = tpu.iota {dimensions = array<i32: 0>} : vector<24x1xi32>
    %198 = vector.broadcast %187 : vector<1x1xi32> to vector<24x1xi32>
    %199 = arith.cmpi slt, %197, %198 : vector<24x1xi32>
    %200 = arith.extui %199 : vector<24x1xi1> to vector<24x1xi32>
    %201 = arith.sitofp %200 : vector<24x1xi32> to vector<24x1xf32>
    %202 = tpu.iota {dimensions = array<i32: 1>} : vector<1x24xi32>
    %203 = vector.broadcast %187 : vector<1x1xi32> to vector<1x24xi32>
    %204 = arith.cmpi slt, %202, %203 : vector<1x24xi32>
    %205 = arith.extui %204 : vector<1x24xi1> to vector<1x24xi32>
    %206 = arith.sitofp %205 : vector<1x24xi32> to vector<1x24xf32>
    %c0_83 = arith.constant 0 : index
    %c0_84 = arith.constant 0 : index
    %207 = vector.load %arg5[%c0_83, %c0_84] : memref<24x32xf32, #tpu.memory_space<vmem>>, vector<24x32xf32>
    %208 = arith.addf %196, %207 : vector<24x32xf32>
    %209 = vector.broadcast %201 : vector<24x1xf32> to vector<24x32xf32>
    %210 = arith.mulf %208, %209 : vector<24x32xf32>
    %c0_85 = arith.constant 0 : index
    %c0_86 = arith.constant 0 : index
    %211 = vector.load %arg18[%c0_85, %c0_86] : memref<32x96xbf16, #tpu.memory_space<vmem>>, vector<32x96xbf16>
    %212 = arith.truncf %210 : vector<24x32xf32> to vector<24x32xbf16>
    %cst_87 = arith.constant dense<0.000000e+00> : vector<24x96xf32>
    %213 = tpu.matmul %212, %211, %cst_87 {dimension_numbers = #tpu.dot_dimension_numbers<[1], [0], [0], [1], [0, 0, 1, 1], [], []>} : vector<24x32xbf16>, vector<32x96xbf16>, vector<24x96xf32> -> vector<24x96xf32>
    %c0_88 = arith.constant 0 : index
    %c0_89 = arith.constant 0 : index
    %214 = vector.load %arg19[%c0_88, %c0_89] : memref<1x96xf32, #tpu.memory_space<vmem>>, vector<1x96xf32>
    %215 = vector.broadcast %214 : vector<1x96xf32> to vector<24x96xf32>
    %216 = arith.addf %213, %215 : vector<24x96xf32>
    %cst_90 = arith.constant 1.000000e+00 : f32
    %217 = vector.broadcast %cst_90 : f32 to vector<1x24xf32>
    %218 = arith.subf %206, %217 : vector<1x24xf32>
    %cst_91 = arith.constant 1.000000e+09 : f32
    %219 = vector.broadcast %cst_91 : f32 to vector<1x24xf32>
    %220 = arith.mulf %218, %219 : vector<1x24xf32>
    %221 = vector.shape_cast %220 : vector<1x24xf32> to vector<1x24xf32>
    %222 = vector.broadcast %221 : vector<1x24xf32> to vector<24x24xf32>
    %223 = vector.extract_strided_slice %216 {offsets = [0, 0], sizes = [24, 16], strides = [1, 1]} : vector<24x96xf32> to vector<24x16xf32>
    %224 = vector.extract_strided_slice %216 {offsets = [0, 32], sizes = [24, 16], strides = [1, 1]} : vector<24x96xf32> to vector<24x16xf32>
    %225 = vector.extract_strided_slice %216 {offsets = [0, 64], sizes = [24, 16], strides = [1, 1]} : vector<24x96xf32> to vector<24x16xf32>
    %226 = arith.truncf %223 : vector<24x16xf32> to vector<24x16xbf16>
    %227 = arith.truncf %224 : vector<24x16xf32> to vector<24x16xbf16>
    %cst_92 = arith.constant dense<0.000000e+00> : vector<24x24xf32>
    %228 = tpu.matmul %226, %227, %cst_92 {dimension_numbers = #tpu.dot_dimension_numbers<[1], [1], [0], [0], [0, 0, 1, 0], [], []>} : vector<24x16xbf16>, vector<24x16xbf16>, vector<24x24xf32> -> vector<24x24xf32>
    %229 = arith.addf %228, %222 : vector<24x24xf32>
    %cst_93 = arith.constant dense<0xFF800000> : vector<24xf32>
    %230 = vector.multi_reduction <maximumf>, %229, %cst_93 [1] : vector<24x24xf32> to vector<24xf32>
    %231 = vector.shape_cast %230 : vector<24xf32> to vector<24x1xf32>
    %232 = vector.broadcast %231 : vector<24x1xf32> to vector<24x24xf32>
    %233 = arith.subf %229, %232 : vector<24x24xf32>
    %234 = math.exp %233 : vector<24x24xf32>
    %cst_94 = arith.constant dense<0.000000e+00> : vector<24xf32>
    %235 = vector.multi_reduction <add>, %234, %cst_94 [1] : vector<24x24xf32> to vector<24xf32>
    %236 = vector.shape_cast %235 : vector<24xf32> to vector<24x1xf32>
    %237 = tpu.reciprocal %236 {approx = true} : vector<24x1xf32> -> vector<24x1xf32>
    %238 = vector.broadcast %237 : vector<24x1xf32> to vector<24x24xf32>
    %239 = arith.mulf %234, %238 : vector<24x24xf32>
    %240 = arith.truncf %239 : vector<24x24xf32> to vector<24x24xbf16>
    %241 = arith.truncf %225 : vector<24x16xf32> to vector<24x16xbf16>
    %cst_95 = arith.constant dense<0.000000e+00> : vector<24x16xf32>
    %242 = tpu.matmul %240, %241, %cst_95 {dimension_numbers = #tpu.dot_dimension_numbers<[1], [0], [0], [1], [0, 0, 1, 1], [], []>} : vector<24x24xbf16>, vector<24x16xbf16>, vector<24x16xf32> -> vector<24x16xf32>
    %c0_96 = arith.constant 0 : index
    %c0_97 = arith.constant 0 : index
    %243 = vector.load %arg20[%c0_96, %c0_97] : memref<32x32xbf16, #tpu.memory_space<vmem>>, vector<16x32xbf16>
    %244 = arith.truncf %242 : vector<24x16xf32> to vector<24x16xbf16>
    %cst_98 = arith.constant dense<0.000000e+00> : vector<24x32xf32>
    %245 = tpu.matmul %244, %243, %cst_98 {dimension_numbers = #tpu.dot_dimension_numbers<[1], [0], [0], [1], [0, 0, 1, 1], [], []>} : vector<24x16xbf16>, vector<16x32xbf16>, vector<24x32xf32> -> vector<24x32xf32>
    %246 = vector.extract_strided_slice %216 {offsets = [0, 16], sizes = [24, 16], strides = [1, 1]} : vector<24x96xf32> to vector<24x16xf32>
    %247 = vector.extract_strided_slice %216 {offsets = [0, 48], sizes = [24, 16], strides = [1, 1]} : vector<24x96xf32> to vector<24x16xf32>
    %248 = vector.extract_strided_slice %216 {offsets = [0, 80], sizes = [24, 16], strides = [1, 1]} : vector<24x96xf32> to vector<24x16xf32>
    %249 = arith.truncf %246 : vector<24x16xf32> to vector<24x16xbf16>
    %250 = arith.truncf %247 : vector<24x16xf32> to vector<24x16xbf16>
    %cst_99 = arith.constant dense<0.000000e+00> : vector<24x24xf32>
    %251 = tpu.matmul %249, %250, %cst_99 {dimension_numbers = #tpu.dot_dimension_numbers<[1], [1], [0], [0], [0, 0, 1, 0], [], []>} : vector<24x16xbf16>, vector<24x16xbf16>, vector<24x24xf32> -> vector<24x24xf32>
    %252 = arith.addf %251, %222 : vector<24x24xf32>
    %cst_100 = arith.constant dense<0xFF800000> : vector<24xf32>
    %253 = vector.multi_reduction <maximumf>, %252, %cst_100 [1] : vector<24x24xf32> to vector<24xf32>
    %254 = vector.shape_cast %253 : vector<24xf32> to vector<24x1xf32>
    %255 = vector.broadcast %254 : vector<24x1xf32> to vector<24x24xf32>
    %256 = arith.subf %252, %255 : vector<24x24xf32>
    %257 = math.exp %256 : vector<24x24xf32>
    %cst_101 = arith.constant dense<0.000000e+00> : vector<24xf32>
    %258 = vector.multi_reduction <add>, %257, %cst_101 [1] : vector<24x24xf32> to vector<24xf32>
    %259 = vector.shape_cast %258 : vector<24xf32> to vector<24x1xf32>
    %260 = tpu.reciprocal %259 {approx = true} : vector<24x1xf32> -> vector<24x1xf32>
    %261 = vector.broadcast %260 : vector<24x1xf32> to vector<24x24xf32>
    %262 = arith.mulf %257, %261 : vector<24x24xf32>
    %263 = arith.truncf %262 : vector<24x24xf32> to vector<24x24xbf16>
    %264 = arith.truncf %248 : vector<24x16xf32> to vector<24x16xbf16>
    %cst_102 = arith.constant dense<0.000000e+00> : vector<24x16xf32>
    %265 = tpu.matmul %263, %264, %cst_102 {dimension_numbers = #tpu.dot_dimension_numbers<[1], [0], [0], [1], [0, 0, 1, 1], [], []>} : vector<24x24xbf16>, vector<24x16xbf16>, vector<24x16xf32> -> vector<24x16xf32>
    %c16_103 = arith.constant 16 : index
    %c0_104 = arith.constant 0 : index
    %266 = vector.load %arg20[%c16_103, %c0_104] : memref<32x32xbf16, #tpu.memory_space<vmem>>, vector<16x32xbf16>
    %267 = arith.truncf %265 : vector<24x16xf32> to vector<24x16xbf16>
    %cst_105 = arith.constant dense<0.000000e+00> : vector<24x32xf32>
    %268 = tpu.matmul %267, %266, %cst_105 {dimension_numbers = #tpu.dot_dimension_numbers<[1], [0], [0], [1], [0, 0, 1, 1], [], []>} : vector<24x16xbf16>, vector<16x32xbf16>, vector<24x32xf32> -> vector<24x32xf32>
    %269 = arith.addf %245, %268 : vector<24x32xf32>
    %c0_106 = arith.constant 0 : index
    %c0_107 = arith.constant 0 : index
    %270 = vector.load %arg21[%c0_106, %c0_107] : memref<1x32xf32, #tpu.memory_space<vmem>>, vector<1x32xf32>
    %271 = vector.broadcast %270 : vector<1x32xf32> to vector<24x32xf32>
    %272 = arith.addf %269, %271 : vector<24x32xf32>
    %273 = arith.addf %210, %272 : vector<24x32xf32>
    %c0_108 = arith.constant 0 : index
    %c0_109 = arith.constant 0 : index
    %274 = vector.load %arg22[%c0_108, %c0_109] : memref<1x32xf32, #tpu.memory_space<vmem>>, vector<1x32xf32>
    %c0_110 = arith.constant 0 : index
    %c0_111 = arith.constant 0 : index
    %275 = vector.load %arg23[%c0_110, %c0_111] : memref<1x32xf32, #tpu.memory_space<vmem>>, vector<1x32xf32>
    %cst_112 = arith.constant dense<0.000000e+00> : vector<24xf32>
    %276 = vector.multi_reduction <add>, %273, %cst_112 [1] : vector<24x32xf32> to vector<24xf32>
    %277 = vector.shape_cast %276 : vector<24xf32> to vector<24x1xf32>
    %cst_113 = arith.constant 3.200000e+01 : f32
    %278 = vector.broadcast %cst_113 : f32 to vector<24x1xf32>
    %279 = arith.divf %277, %278 : vector<24x1xf32>
    %280 = vector.broadcast %279 : vector<24x1xf32> to vector<24x32xf32>
    %281 = arith.subf %273, %280 : vector<24x32xf32>
    %282 = arith.mulf %281, %281 : vector<24x32xf32>
    %cst_114 = arith.constant dense<0.000000e+00> : vector<24xf32>
    %283 = vector.multi_reduction <add>, %282, %cst_114 [1] : vector<24x32xf32> to vector<24xf32>
    %284 = vector.shape_cast %283 : vector<24xf32> to vector<24x1xf32>
    %cst_115 = arith.constant 3.200000e+01 : f32
    %285 = vector.broadcast %cst_115 : f32 to vector<24x1xf32>
    %286 = arith.divf %284, %285 : vector<24x1xf32>
    %287 = vector.broadcast %279 : vector<24x1xf32> to vector<24x32xf32>
    %288 = arith.subf %273, %287 : vector<24x32xf32>
    %cst_116 = arith.constant 9.99999974E-6 : f32
    %289 = vector.broadcast %cst_116 : f32 to vector<24x1xf32>
    %290 = arith.addf %286, %289 : vector<24x1xf32>
    %291 = math.rsqrt %290 : vector<24x1xf32>
    %292 = vector.broadcast %291 : vector<24x1xf32> to vector<24x32xf32>
    %293 = arith.mulf %288, %292 : vector<24x32xf32>
    %294 = vector.broadcast %274 : vector<1x32xf32> to vector<24x32xf32>
    %295 = arith.mulf %293, %294 : vector<24x32xf32>
    %296 = vector.broadcast %275 : vector<1x32xf32> to vector<24x32xf32>
    %297 = arith.addf %295, %296 : vector<24x32xf32>
    %298 = vector.broadcast %201 : vector<24x1xf32> to vector<24x32xf32>
    %299 = arith.mulf %297, %298 : vector<24x32xf32>
    %300 = tpu.iota {dimensions = array<i32: 0>} : vector<24x24xi32>
    %301 = tpu.iota {dimensions = array<i32: 1>} : vector<24x24xi32>
    %c1_i32_117 = arith.constant 1 : i32
    %302 = vector.broadcast %c1_i32_117 : i32 to vector<24x24xi32>
    %303 = arith.addi %301, %302 : vector<24x24xi32>
    %304 = arith.cmpi eq, %300, %303 : vector<24x24xi32>
    %305 = arith.extui %304 : vector<24x24xi1> to vector<24x24xi32>
    %306 = arith.sitofp %305 : vector<24x24xi32> to vector<24x24xf32>
    %c1_i32_118 = arith.constant 1 : i32
    %307 = vector.broadcast %c1_i32_118 : i32 to vector<24x24xi32>
    %308 = arith.addi %300, %307 : vector<24x24xi32>
    %309 = arith.cmpi eq, %308, %301 : vector<24x24xi32>
    %310 = arith.extui %309 : vector<24x24xi1> to vector<24x24xi32>
    %311 = arith.sitofp %310 : vector<24x24xi32> to vector<24x24xf32>
    %cst_119 = arith.constant dense<0.000000e+00> : vector<24x32xf32>
    %312 = tpu.matmul %306, %299, %cst_119 {dimension_numbers = #tpu.dot_dimension_numbers<[1], [0], [0], [1], [0, 0, 1, 1], [], []>} : vector<24x24xf32>, vector<24x32xf32>, vector<24x32xf32> -> vector<24x32xf32>
    %cst_120 = arith.constant dense<0.000000e+00> : vector<24x32xf32>
    %313 = tpu.matmul %311, %299, %cst_120 {dimension_numbers = #tpu.dot_dimension_numbers<[1], [0], [0], [1], [0, 0, 1, 1], [], []>} : vector<24x24xf32>, vector<24x32xf32>, vector<24x32xf32> -> vector<24x32xf32>
    %c0_121 = arith.constant 0 : index
    %c0_122 = arith.constant 0 : index
    %c0_123 = arith.constant 0 : index
    %314 = vector.load %arg24[%c0_121, %c0_122, %c0_123] : memref<3x32x64xbf16, #tpu.memory_space<vmem>>, vector<1x32x64xbf16>
    %315 = vector.shape_cast %314 : vector<1x32x64xbf16> to vector<32x64xbf16>
    %316 = arith.truncf %312 : vector<24x32xf32> to vector<24x32xbf16>
    %cst_124 = arith.constant dense<0.000000e+00> : vector<24x64xf32>
    %317 = tpu.matmul %316, %315, %cst_124 {dimension_numbers = #tpu.dot_dimension_numbers<[1], [0], [0], [1], [0, 0, 1, 1], [], []>} : vector<24x32xbf16>, vector<32x64xbf16>, vector<24x64xf32> -> vector<24x64xf32>
    %c1_125 = arith.constant 1 : index
    %c0_126 = arith.constant 0 : index
    %c0_127 = arith.constant 0 : index
    %318 = vector.load %arg24[%c1_125, %c0_126, %c0_127] : memref<3x32x64xbf16, #tpu.memory_space<vmem>>, vector<1x32x64xbf16>
    %319 = vector.shape_cast %318 : vector<1x32x64xbf16> to vector<32x64xbf16>
    %320 = arith.truncf %299 : vector<24x32xf32> to vector<24x32xbf16>
    %cst_128 = arith.constant dense<0.000000e+00> : vector<24x64xf32>
    %321 = tpu.matmul %320, %319, %cst_128 {dimension_numbers = #tpu.dot_dimension_numbers<[1], [0], [0], [1], [0, 0, 1, 1], [], []>} : vector<24x32xbf16>, vector<32x64xbf16>, vector<24x64xf32> -> vector<24x64xf32>
    %322 = arith.addf %317, %321 : vector<24x64xf32>
    %c2_129 = arith.constant 2 : index
    %c0_130 = arith.constant 0 : index
    %c0_131 = arith.constant 0 : index
    %323 = vector.load %arg24[%c2_129, %c0_130, %c0_131] : memref<3x32x64xbf16, #tpu.memory_space<vmem>>, vector<1x32x64xbf16>
    %324 = vector.shape_cast %323 : vector<1x32x64xbf16> to vector<32x64xbf16>
    %325 = arith.truncf %313 : vector<24x32xf32> to vector<24x32xbf16>
    %cst_132 = arith.constant dense<0.000000e+00> : vector<24x64xf32>
    %326 = tpu.matmul %325, %324, %cst_132 {dimension_numbers = #tpu.dot_dimension_numbers<[1], [0], [0], [1], [0, 0, 1, 1], [], []>} : vector<24x32xbf16>, vector<32x64xbf16>, vector<24x64xf32> -> vector<24x64xf32>
    %327 = arith.addf %322, %326 : vector<24x64xf32>
    %c0_133 = arith.constant 0 : index
    %c0_134 = arith.constant 0 : index
    %328 = vector.load %arg25[%c0_133, %c0_134] : memref<1x64xf32, #tpu.memory_space<vmem>>, vector<1x64xf32>
    %329 = vector.broadcast %328 : vector<1x64xf32> to vector<24x64xf32>
    %330 = arith.addf %327, %329 : vector<24x64xf32>
    %cst_135 = arith.constant 0.000000e+00 : f32
    %331 = vector.broadcast %cst_135 : f32 to vector<24x64xf32>
    %332 = arith.maximumf %330, %331 : vector<24x64xf32>
    %333 = vector.broadcast %201 : vector<24x1xf32> to vector<24x64xf32>
    %334 = arith.mulf %332, %333 : vector<24x64xf32>
    %cst_136 = arith.constant dense<0.000000e+00> : vector<24x64xf32>
    %335 = tpu.matmul %306, %334, %cst_136 {dimension_numbers = #tpu.dot_dimension_numbers<[1], [0], [0], [1], [0, 0, 1, 1], [], []>} : vector<24x24xf32>, vector<24x64xf32>, vector<24x64xf32> -> vector<24x64xf32>
    %cst_137 = arith.constant dense<0.000000e+00> : vector<24x64xf32>
    %336 = tpu.matmul %311, %334, %cst_137 {dimension_numbers = #tpu.dot_dimension_numbers<[1], [0], [0], [1], [0, 0, 1, 1], [], []>} : vector<24x24xf32>, vector<24x64xf32>, vector<24x64xf32> -> vector<24x64xf32>
    %c0_138 = arith.constant 0 : index
    %c0_139 = arith.constant 0 : index
    %c0_140 = arith.constant 0 : index
    %337 = vector.load %arg26[%c0_138, %c0_139, %c0_140] : memref<3x64x32xbf16, #tpu.memory_space<vmem>>, vector<1x64x32xbf16>
    %338 = vector.shape_cast %337 : vector<1x64x32xbf16> to vector<64x32xbf16>
    %339 = arith.truncf %335 : vector<24x64xf32> to vector<24x64xbf16>
    %cst_141 = arith.constant dense<0.000000e+00> : vector<24x32xf32>
    %340 = tpu.matmul %339, %338, %cst_141 {dimension_numbers = #tpu.dot_dimension_numbers<[1], [0], [0], [1], [0, 0, 1, 1], [], []>} : vector<24x64xbf16>, vector<64x32xbf16>, vector<24x32xf32> -> vector<24x32xf32>
    %c1_142 = arith.constant 1 : index
    %c0_143 = arith.constant 0 : index
    %c0_144 = arith.constant 0 : index
    %341 = vector.load %arg26[%c1_142, %c0_143, %c0_144] : memref<3x64x32xbf16, #tpu.memory_space<vmem>>, vector<1x64x32xbf16>
    %342 = vector.shape_cast %341 : vector<1x64x32xbf16> to vector<64x32xbf16>
    %343 = arith.truncf %334 : vector<24x64xf32> to vector<24x64xbf16>
    %cst_145 = arith.constant dense<0.000000e+00> : vector<24x32xf32>
    %344 = tpu.matmul %343, %342, %cst_145 {dimension_numbers = #tpu.dot_dimension_numbers<[1], [0], [0], [1], [0, 0, 1, 1], [], []>} : vector<24x64xbf16>, vector<64x32xbf16>, vector<24x32xf32> -> vector<24x32xf32>
    %345 = arith.addf %340, %344 : vector<24x32xf32>
    %c2_146 = arith.constant 2 : index
    %c0_147 = arith.constant 0 : index
    %c0_148 = arith.constant 0 : index
    %346 = vector.load %arg26[%c2_146, %c0_147, %c0_148] : memref<3x64x32xbf16, #tpu.memory_space<vmem>>, vector<1x64x32xbf16>
    %347 = vector.shape_cast %346 : vector<1x64x32xbf16> to vector<64x32xbf16>
    %348 = arith.truncf %336 : vector<24x64xf32> to vector<24x64xbf16>
    %cst_149 = arith.constant dense<0.000000e+00> : vector<24x32xf32>
    %349 = tpu.matmul %348, %347, %cst_149 {dimension_numbers = #tpu.dot_dimension_numbers<[1], [0], [0], [1], [0, 0, 1, 1], [], []>} : vector<24x64xbf16>, vector<64x32xbf16>, vector<24x32xf32> -> vector<24x32xf32>
    %350 = arith.addf %345, %349 : vector<24x32xf32>
    %c0_150 = arith.constant 0 : index
    %c0_151 = arith.constant 0 : index
    %351 = vector.load %arg27[%c0_150, %c0_151] : memref<1x32xf32, #tpu.memory_space<vmem>>, vector<1x32xf32>
    %352 = vector.broadcast %351 : vector<1x32xf32> to vector<24x32xf32>
    %353 = arith.addf %350, %352 : vector<24x32xf32>
    %354 = arith.addf %297, %353 : vector<24x32xf32>
    %c0_152 = arith.constant 0 : index
    %c0_153 = arith.constant 0 : index
    %355 = vector.load %arg28[%c0_152, %c0_153] : memref<1x32xf32, #tpu.memory_space<vmem>>, vector<1x32xf32>
    %c0_154 = arith.constant 0 : index
    %c0_155 = arith.constant 0 : index
    %356 = vector.load %arg29[%c0_154, %c0_155] : memref<1x32xf32, #tpu.memory_space<vmem>>, vector<1x32xf32>
    %cst_156 = arith.constant dense<0.000000e+00> : vector<24xf32>
    %357 = vector.multi_reduction <add>, %354, %cst_156 [1] : vector<24x32xf32> to vector<24xf32>
    %358 = vector.shape_cast %357 : vector<24xf32> to vector<24x1xf32>
    %cst_157 = arith.constant 3.200000e+01 : f32
    %359 = vector.broadcast %cst_157 : f32 to vector<24x1xf32>
    %360 = arith.divf %358, %359 : vector<24x1xf32>
    %361 = vector.broadcast %360 : vector<24x1xf32> to vector<24x32xf32>
    %362 = arith.subf %354, %361 : vector<24x32xf32>
    %363 = arith.mulf %362, %362 : vector<24x32xf32>
    %cst_158 = arith.constant dense<0.000000e+00> : vector<24xf32>
    %364 = vector.multi_reduction <add>, %363, %cst_158 [1] : vector<24x32xf32> to vector<24xf32>
    %365 = vector.shape_cast %364 : vector<24xf32> to vector<24x1xf32>
    %cst_159 = arith.constant 3.200000e+01 : f32
    %366 = vector.broadcast %cst_159 : f32 to vector<24x1xf32>
    %367 = arith.divf %365, %366 : vector<24x1xf32>
    %368 = vector.broadcast %360 : vector<24x1xf32> to vector<24x32xf32>
    %369 = arith.subf %354, %368 : vector<24x32xf32>
    %cst_160 = arith.constant 9.99999974E-6 : f32
    %370 = vector.broadcast %cst_160 : f32 to vector<24x1xf32>
    %371 = arith.addf %367, %370 : vector<24x1xf32>
    %372 = math.rsqrt %371 : vector<24x1xf32>
    %373 = vector.broadcast %372 : vector<24x1xf32> to vector<24x32xf32>
    %374 = arith.mulf %369, %373 : vector<24x32xf32>
    %375 = vector.broadcast %355 : vector<1x32xf32> to vector<24x32xf32>
    %376 = arith.mulf %374, %375 : vector<24x32xf32>
    %377 = vector.broadcast %356 : vector<1x32xf32> to vector<24x32xf32>
    %378 = arith.addf %376, %377 : vector<24x32xf32>
    %379 = vector.broadcast %201 : vector<24x1xf32> to vector<24x32xf32>
    %380 = arith.mulf %378, %379 : vector<24x32xf32>
    %c0_161 = arith.constant 0 : index
    %c0_162 = arith.constant 0 : index
    %381 = vector.load %arg30[%c0_161, %c0_162] : memref<16x32xbf16, #tpu.memory_space<vmem>>, vector<16x32xbf16>
    %382 = arith.truncf %380 : vector<24x32xf32> to vector<24x32xbf16>
    %cst_163 = arith.constant dense<0.000000e+00> : vector<16x24xf32>
    %383 = tpu.matmul %381, %382, %cst_163 {dimension_numbers = #tpu.dot_dimension_numbers<[1], [1], [0], [0], [0, 0, 1, 0], [], []>} : vector<16x32xbf16>, vector<24x32xbf16>, vector<16x24xf32> -> vector<16x24xf32>
    %c0_164 = arith.constant 0 : index
    %c0_165 = arith.constant 0 : index
    %384 = vector.load %arg31[%c0_164, %c0_165] : memref<16x1xf32, #tpu.memory_space<vmem>>, vector<16x1xf32>
    %385 = vector.broadcast %384 : vector<16x1xf32> to vector<16x24xf32>
    %386 = arith.addf %383, %385 : vector<16x24xf32>
    %387 = vector.broadcast %206 : vector<1x24xf32> to vector<16x24xf32>
    %388 = arith.mulf %386, %387 : vector<16x24xf32>
    %c0_166 = arith.constant 0 : index
    %c0_167 = arith.constant 0 : index
    %c0_168 = arith.constant 0 : index
    %389 = vector.load %arg32[%c0_166, %c0_167, %c0_168] : memref<1x16x24xf32, #tpu.memory_space<vmem>>, vector<1x16x24xf32>
    %390 = vector.shape_cast %389 : vector<1x16x24xf32> to vector<16x24xf32>
    %391 = vector.shape_cast %388 : vector<16x24xf32> to vector<1x16x24xf32>
    tpu.vector_store %arg32[%c0_166, %c0_167, %c0_168], %391 {strides = array<i32>} : memref<1x16x24xf32, #tpu.memory_space<vmem>>, vector<1x16x24xf32>,
    return
  }
  func.func @transform_0(%arg0: i32) -> (i32, i32, i32) {
    %c0_i32 = arith.constant 0 : i32
    %c0_i32_0 = arith.constant 0 : i32
    %c0_i32_1 = arith.constant 0 : i32
    return %arg0, %c0_i32, %c0_i32_0 : i32, i32, i32
  }
  func.func @transform_1(%arg0: i32) -> (i32, i32, i32) {
    %c0_i32 = arith.constant 0 : i32
    %c0_i32_0 = arith.constant 0 : i32
    %c0_i32_1 = arith.constant 0 : i32
    return %arg0, %c0_i32, %c0_i32_0 : i32, i32, i32
  }
  func.func @transform_2(%arg0: i32) -> (i32, i32) {
    %c0_i32 = arith.constant 0 : i32
    %c0_i32_0 = arith.constant 0 : i32
    %c0_i32_1 = arith.constant 0 : i32
    return %c0_i32, %c0_i32_0 : i32, i32
  }
  func.func @transform_3(%arg0: i32) -> (i32, i32) {
    %c0_i32 = arith.constant 0 : i32
    %c0_i32_0 = arith.constant 0 : i32
    %c0_i32_1 = arith.constant 0 : i32
    return %c0_i32, %c0_i32_0 : i32, i32
  }
  func.func @transform_4(%arg0: i32) -> (i32, i32) {
    %c0_i32 = arith.constant 0 : i32
    %c0_i32_0 = arith.constant 0 : i32
    %c0_i32_1 = arith.constant 0 : i32
    return %c0_i32, %c0_i32_0 : i32, i32
  }
  func.func @transform_5(%arg0: i32) -> (i32, i32) {
    %c0_i32 = arith.constant 0 : i32
    %c0_i32_0 = arith.constant 0 : i32
    %c0_i32_1 = arith.constant 0 : i32
    return %c0_i32, %c0_i32_0 : i32, i32
  }
  func.func @transform_6(%arg0: i32) -> (i32, i32) {
    %c0_i32 = arith.constant 0 : i32
    %c0_i32_0 = arith.constant 0 : i32
    %c0_i32_1 = arith.constant 0 : i32
    return %c0_i32, %c0_i32_0 : i32, i32
  }
  func.func @transform_7(%arg0: i32) -> (i32, i32) {
    %c0_i32 = arith.constant 0 : i32
    %c0_i32_0 = arith.constant 0 : i32
    %c0_i32_1 = arith.constant 0 : i32
    return %c0_i32, %c0_i32_0 : i32, i32
  }
  func.func @transform_8(%arg0: i32) -> (i32, i32) {
    %c0_i32 = arith.constant 0 : i32
    %c0_i32_0 = arith.constant 0 : i32
    %c0_i32_1 = arith.constant 0 : i32
    return %c0_i32, %c0_i32_0 : i32, i32
  }
  func.func @transform_9(%arg0: i32) -> (i32, i32) {
    %c0_i32 = arith.constant 0 : i32
    %c0_i32_0 = arith.constant 0 : i32
    %c0_i32_1 = arith.constant 0 : i32
    return %c0_i32, %c0_i32_0 : i32, i32
  }
  func.func @transform_10(%arg0: i32) -> (i32, i32) {
    %c0_i32 = arith.constant 0 : i32
    %c0_i32_0 = arith.constant 0 : i32
    %c0_i32_1 = arith.constant 0 : i32
    return %c0_i32, %c0_i32_0 : i32, i32
  }
  func.func @transform_11(%arg0: i32) -> (i32, i32, i32) {
    %c0_i32 = arith.constant 0 : i32
    %c0_i32_0 = arith.constant 0 : i32
    %c0_i32_1 = arith.constant 0 : i32
    %c0_i32_2 = arith.constant 0 : i32
    return %c0_i32, %c0_i32_0, %c0_i32_1 : i32, i32, i32
  }
  func.func @transform_12(%arg0: i32) -> (i32, i32) {
    %c0_i32 = arith.constant 0 : i32
    %c0_i32_0 = arith.constant 0 : i32
    %c0_i32_1 = arith.constant 0 : i32
    return %c0_i32, %c0_i32_0 : i32, i32
  }
  func.func @transform_13(%arg0: i32) -> (i32, i32, i32) {
    %c0_i32 = arith.constant 0 : i32
    %c0_i32_0 = arith.constant 0 : i32
    %c0_i32_1 = arith.constant 0 : i32
    %c0_i32_2 = arith.constant 0 : i32
    return %c0_i32, %c0_i32_0, %c0_i32_1 : i32, i32, i32
  }
  func.func @transform_14(%arg0: i32) -> (i32, i32) {
    %c0_i32 = arith.constant 0 : i32
    %c0_i32_0 = arith.constant 0 : i32
    %c0_i32_1 = arith.constant 0 : i32
    return %c0_i32, %c0_i32_0 : i32, i32
  }
  func.func @transform_15(%arg0: i32) -> (i32, i32) {
    %c0_i32 = arith.constant 0 : i32
    %c0_i32_0 = arith.constant 0 : i32
    %c0_i32_1 = arith.constant 0 : i32
    return %c0_i32, %c0_i32_0 : i32, i32
  }
  func.func @transform_16(%arg0: i32) -> (i32, i32) {
    %c0_i32 = arith.constant 0 : i32
    %c0_i32_0 = arith.constant 0 : i32
    %c0_i32_1 = arith.constant 0 : i32
    return %c0_i32, %c0_i32_0 : i32, i32
  }
  func.func @transform_17(%arg0: i32) -> (i32, i32) {
    %c0_i32 = arith.constant 0 : i32
    %c0_i32_0 = arith.constant 0 : i32
    %c0_i32_1 = arith.constant 0 : i32
    return %c0_i32, %c0_i32_0 : i32, i32
  }
  func.func @transform_18(%arg0: i32) -> (i32, i32) {
    %c0_i32 = arith.constant 0 : i32
    %c0_i32_0 = arith.constant 0 : i32
    %c0_i32_1 = arith.constant 0 : i32
    return %c0_i32, %c0_i32_0 : i32, i32
  }
  func.func @transform_19(%arg0: i32) -> (i32, i32) {
    %c0_i32 = arith.constant 0 : i32
    %c0_i32_0 = arith.constant 0 : i32
    %c0_i32_1 = arith.constant 0 : i32
    return %c0_i32, %c0_i32_0 : i32, i32
  }
  func.func @transform_20(%arg0: i32) -> (i32, i32) {
    %c0_i32 = arith.constant 0 : i32
    %c0_i32_0 = arith.constant 0 : i32
    %c0_i32_1 = arith.constant 0 : i32
    return %c0_i32, %c0_i32_0 : i32, i32
  }
  func.func @transform_21(%arg0: i32) -> (i32, i32) {
    %c0_i32 = arith.constant 0 : i32
    %c0_i32_0 = arith.constant 0 : i32
    %c0_i32_1 = arith.constant 0 : i32
    return %c0_i32, %c0_i32_0 : i32, i32
  }
  func.func @transform_22(%arg0: i32) -> (i32, i32) {
    %c0_i32 = arith.constant 0 : i32
    %c0_i32_0 = arith.constant 0 : i32
    %c0_i32_1 = arith.constant 0 : i32
    return %c0_i32, %c0_i32_0 : i32, i32
  }
  func.func @transform_23(%arg0: i32) -> (i32, i32, i32) {
    %c0_i32 = arith.constant 0 : i32
    %c0_i32_0 = arith.constant 0 : i32
    %c0_i32_1 = arith.constant 0 : i32
    %c0_i32_2 = arith.constant 0 : i32
    return %c0_i32, %c0_i32_0, %c0_i32_1 : i32, i32, i32
  }
  func.func @transform_24(%arg0: i32) -> (i32, i32) {
    %c0_i32 = arith.constant 0 : i32
    %c0_i32_0 = arith.constant 0 : i32
    %c0_i32_1 = arith.constant 0 : i32
    return %c0_i32, %c0_i32_0 : i32, i32
  }
  func.func @transform_25(%arg0: i32) -> (i32, i32, i32) {
    %c0_i32 = arith.constant 0 : i32
    %c0_i32_0 = arith.constant 0 : i32
    %c0_i32_1 = arith.constant 0 : i32
    %c0_i32_2 = arith.constant 0 : i32
    return %c0_i32, %c0_i32_0, %c0_i32_1 : i32, i32, i32
  }
  func.func @transform_26(%arg0: i32) -> (i32, i32) {
    %c0_i32 = arith.constant 0 : i32
    %c0_i32_0 = arith.constant 0 : i32
    %c0_i32_1 = arith.constant 0 : i32
    return %c0_i32, %c0_i32_0 : i32, i32
  }
  func.func @transform_27(%arg0: i32) -> (i32, i32) {
    %c0_i32 = arith.constant 0 : i32
    %c0_i32_0 = arith.constant 0 : i32
    %c0_i32_1 = arith.constant 0 : i32
    return %c0_i32, %c0_i32_0 : i32, i32
  }
  func.func @transform_28(%arg0: i32) -> (i32, i32) {
    %c0_i32 = arith.constant 0 : i32
    %c0_i32_0 = arith.constant 0 : i32
    %c0_i32_1 = arith.constant 0 : i32
    return %c0_i32, %c0_i32_0 : i32, i32
  }
  func.func @transform_29(%arg0: i32) -> (i32, i32) {
    %c0_i32 = arith.constant 0 : i32
    %c0_i32_0 = arith.constant 0 : i32
    %c0_i32_1 = arith.constant 0 : i32
    return %c0_i32, %c0_i32_0 : i32, i32
  }
  func.func @transform_30(%arg0: i32) -> (i32, i32) {
    %c0_i32 = arith.constant 0 : i32
    %c0_i32_0 = arith.constant 0 : i32
    %c0_i32_1 = arith.constant 0 : i32
    return %c0_i32, %c0_i32_0 : i32, i32
  }
  func.func @transform_31(%arg0: i32) -> (i32, i32, i32) {
    %c0_i32 = arith.constant 0 : i32
    %c0_i32_0 = arith.constant 0 : i32
    %c0_i32_1 = arith.constant 0 : i32
    return %arg0, %c0_i32, %c0_i32_0 : i32, i32, i32
  }
}

</mosaic_0001>

<bundles_post_ra>
// kernel: fastspeech_forward.1
= control target key start
LH: loop header
LB: loop body
LE: loop exit
PB: predicated region body
PF: predicated region fallthrough
CT: control target
= control target key end

     0   :  { %s3481_s6 = smov 1   ;;  %s3482_s10 = smov 2   ;;  %s4146_s0 = inlined_call_operand.smem [shape: u32[32], index: -1, kind: input, shape index: {}] }
   0x1   :  { %s3530_s5 = sld [smem:[%s4146_s0]]   ;;  %s3483_s14 = smov 3  }
   0x2   :  { %s3535_s9 = sld [smem:[%s4146_s0 + %s3481_s6]]   ;;  %s3484_s18 = smov 4  }
   0x3   :  { %s3540_s13 = sld [smem:[%s4146_s0 + %s3482_s10]]   ;;  %s3485_s22 = smov 5  }
   0x4   :  { %s3545_s17 = sld [smem:[%s4146_s0 + %s3483_s14]]   ;;  %s3486_s26 = smov 6  }
   0x5   :  { %s3550_s21 = sld [smem:[%s4146_s0 + %s3484_s18]]   ;;  %s3487_s30 = smov 7  }
   0x6   :  { %s3555_s25 = sld [smem:[%s4146_s0 + %s3485_s22]]   ;;  %s3488_s4 = smov 8  }
   0x7   :  { %4165 = sst [smem:[#allocation5_spill]] %s3530_s5  ;;  %s3489_s10 = smov 9  }
   0x8   :  { %4166 = sst [smem:[#allocation6_spill]] %s3535_s9  ;;  %s3490_s15 = smov 10  }
   0x9   :  { %4167 = sst [smem:[#allocation7_spill]] %s3540_s13  ;;  %s3491_s20 = smov 11  }
   0xa   :  { %s3560_s29 = sld [smem:[%s4146_s0 + %s3486_s26]]   ;;  %s3492_s26 = smov 12  }
   0xb   :  { %4168 = sst [smem:[#allocation8_spill]] %s3550_s21  ;;  %s3493_s1 = smov 13  }
   0xc   :  { %s3565_s3 = sld [smem:[%s4146_s0 + %s3487_s30]]   ;;  %s3494_s7 = smov 14  }
   0xd   :  { %s3570_s8 = sld [smem:[%s4146_s0 + %s3488_s4]]   ;;  %s3496_s22 = smov 16  }
   0xe   :  { %s3575_s14 = sld [smem:[%s4146_s0 + %s3489_s10]]   ;;  %s3497_s28 = smov 17  }
   0xf   :  { %s3580_s19 = sld [smem:[%s4146_s0 + %s3490_s15]]   ;;  %s3495_s15 = smov 15  }
  0x10   :  { %s3585_s24 = sld [smem:[%s4146_s0 + %s3491_s20]]  }
  0x11   :  { %s3590_s30 = sld [smem:[%s4146_s0 + %s3492_s26]]  }
  0x12   :  { %4169 = sst [smem:[#allocation9_spill]] %s3565_s3 }
  0x13   :  { %4170 = sst [smem:[#allocation10_spill]] %s3570_s8 }
  0x14   :  { %s3595_s6 = sld [smem:[%s4146_s0 + %s3493_s1]]  }
  0x15   :  { %s3600_s12 = sld [smem:[%s4146_s0 + %s3494_s7]]   ;;  %s3498_s7 = smov 18  }
  0x16   :  { %s3605_s20 = sld [smem:[%s4146_s0 + %s3495_s15]]   ;;  %s3499_s15 = smov 19  }
  0x17   :  { %s3610_s27 = sld [smem:[%s4146_s0 + %s3496_s22]]   ;;  %s3500_s22 = smov 20  }
  0x18   :  { %s3615_s4 = sld [smem:[%s4146_s0 + %s3497_s28]]   ;;  %s3501_s28 = smov 21  }
  0x19   :  { %s3620_s21 = sld [smem:[%s4146_s0 + %s3498_s7]]   ;;  %s3502_s7 = smov 22  }
  0x1a   :  { %4171 = sst [smem:[#allocation11_spill]] %s3595_s6 }
  0x1c   :  { %4172 = sst [smem:[#allocation12_spill]] %s3605_s20 }
  0x1d   :  { %4173 = sst [smem:[#allocation13_spill]] %s3610_s27 }
  0x1e   :  { %4174 = sst [smem:[#allocation14_spill]] %s3615_s4 }
  0x1f   :  { %4175 = sst [smem:[#allocation15_spill]] %s3620_s21 }
  0x20   :  { %s3625_s20 = sld [smem:[%s4146_s0 + %s3499_s15]]   ;;  %s3503_s15 = smov 23  }
  0x21   :  { %s3630_s27 = sld [smem:[%s4146_s0 + %s3500_s22]]   ;;  %s3504_s22 = smov 24  }
  0x22   :  { %s3635_s4 = sld [smem:[%s4146_s0 + %s3501_s28]]   ;;  %s3505_s28 = smov 25  }
  0x23   :  { %s3640_s21 = sld [smem:[%s4146_s0 + %s3502_s7]]   ;;  %s3506_s7 = smov 26  }
  0x26   :  { %4176 = sst [smem:[#allocation16_spill]] %s3625_s20 }
  0x27   :  { %4177 = sst [smem:[#allocation17_spill]] %s3630_s27 }
  0x28   :  { %4178 = sst [smem:[#allocation18_spill]] %s3635_s4 }
  0x29   :  { %4179 = sst [smem:[#allocation19_spill]] %s3640_s21 }
  0x2a   :  { %s3645_s20 = sld [smem:[%s4146_s0 + %s3503_s15]]   ;;  %s3507_s15 = smov 27  }
  0x2b   :  { %s3650_s27 = sld [smem:[%s4146_s0 + %s3504_s22]]   ;;  %s3508_s22 = smov 28  }
  0x2c   :  { %s3655_s4 = sld [smem:[%s4146_s0 + %s3505_s28]]   ;;  %s3509_s28 = smov 29  }
  0x2d   :  { %s3660_s21 = sld [smem:[%s4146_s0 + %s3506_s7]]   ;;  %s3510_s7 = smov 30  }
  0x30   :  { %4180 = sst [smem:[#allocation20_spill]] %s3645_s20 }
  0x31   :  { %4181 = sst [smem:[#allocation21_spill]] %s3650_s27 }
  0x32   :  { %4182 = sst [smem:[#allocation22_spill]] %s3655_s4 }
  0x33   :  { %4183 = sst [smem:[#allocation23_spill]] %s3660_s21 }
  0x34   :  { %s3665_s20 = sld [smem:[%s4146_s0 + %s3507_s15]]   ;;  %s3511_s15 = smov 31  }
  0x35   :  { %s3670_s27 = sld [smem:[%s4146_s0 + %s3508_s22]]  }
  0x36   :  { %s3675_s4 = sld [smem:[%s4146_s0 + %s3509_s28]]  }
  0x37   :  { %s3680_s21 = sld [smem:[%s4146_s0 + %s3510_s7]]  }
  0x3a   :  { %4184 = sst [smem:[#allocation24_spill]] %s3665_s20 }
  0x3b   :  { %s3685_s20 = sld [smem:[%s4146_s0 + %s3511_s15]]  }
  0x3c   :  { %4185 = sst [smem:[#allocation25_spill]] %s3675_s4 }
  0x3d   :  { %68 = vsyncpa [#allocation3], 0 }
  0x3e   :  { %70 = vsyncpa [#allocation3 + $0x1], 0  ;;  %s3687_s22 = smov 0   ;;  %s3689_s23 = smov 0  }
  0x3f   :  { %s3691_s26 = smov 0   ;;  %s3693_s28 = smov 0  }
  0x40 LB: > { %s4186_s6 = sld [smem:[#allocation11_spill]]  ;;  %s3708_s0 = sadd.s32 4294967295, %s3479_s28   ;;  %s3475_s26 = sphi %s3691_s26, %s4215_s26   ;;  %s3471_s23 = sphi %s3689_s23, %s4214_s23   ;;  %s3467_s22 = sphi %s3687_s22, %s4213_s22   ;;  %s3479_s28 = sphi %s3693_s28, %s4216_s28  }
  0x41   : > { %s4187_s3 = sld [smem:[#allocation9_spill]]  ;;  %s2905_s1 = sadd.s32 4294967294, %s3479_s28  }
  0x42   : > { %s4188_s13 = sld [smem:[#allocation7_spill]]  ;;  %s3712_s2 = sadd.s32 1, %s3479_s28  }
  0x43   : > { %s744_s7 = sadd.s32 1, %s3475_s26  ;;  %s741_s10 = ssub.s32 %s3479_s28, %s3712_s2 }
  0x44   : > { %p754_p0 = scmp.ne.s32.totalorder %s3475_s26, %s3471_s23  ;;  %p742_p1 = scmp.eq.s32.totalorder %s741_s10, 0 }
  0x45   : > { %p755_p2 = scmp.eq.s32.totalorder %s3708_s0, 1  ;;  %p760_p3 = scmp.ne.s32.totalorder %s3471_s23, %s3467_s22 }
  0x46   : > { %p761_p4 = scmp.eq.s32.totalorder %s2905_s1, 1  ;;  %p2908_p7 = scmp.ge.s32.totalorder %s3479_s28, 1 }
  0x47   : > { %s3723_s11 = scalar_select %p742_p1, %s3475_s26, %s744_s7  }
  0x48   : > { %p3725_p5 = por %p755_p2, %p754_p0  ;;  %p3729_p6 = por %p761_p4, %p760_p3 }
  0x49   : > { %p880_p8 = scmp.lt.s32.totalorder %s3479_s28, 3 }
  0x4b   : > { %p881_p9 = pnand %p2908_p7, %p880_p8 }
  0x4c   : > { %s4191_s5 = sld [smem:[#allocation5_spill]] (!%p881_p9)  ;;  %p963_p10 = scmp.lt.s32.totalorder (!%p881_p9), %s3708_s0, 1 }
  0x4d   : > { %884 = sbr.rel (%p881_p9) target bundleno = 4795 (0x12bb), region = 144  ;;  %s3514_s10 = smov (!%p881_p9), 80  }
  0x4e   : > { %s4192_s8 = sld [smem:[#allocation10_spill]] (!%p881_p9) }
  0x4f   : > { %s4193_s9 = sld [smem:[#allocation6_spill]] (!%p881_p9) }
  0x50   : > { %s4212_s4 = sld [smem:[#allocation25_spill]] (!%p881_p9) }
  0x52   : > { %v984_v0 = vld [vmem:[%s4188_s13 + $0x18] sm:$0xff]  ;;  %v983_v1 = vld [vmem:[%s4188_s13 + $0x10] sm:$0xff]  ;;  %v3512_v2 = vmov 0   ;;  %s3740_s18 = scalar_select %p963_p10, %s3708_s0, 1  ;;  %v982_v3 = vld [vmem:[%s4188_s13 + $0x8] sm:$0xff]  ;;  %v973_v7 = vlaneseq  ;;  %vm986_vm0 = vcmask 261120  }
  0x53   : > { %3348 = vset.pattern.permute.xlu0 %v3512_v2  ;;  %1002 = vmatpush.msra.mxu2 %v984_v0  ;;  %v981_v5 = vld [vmem:[%s4188_s13] sm:$0xff]  ;;  %v3221_v6 = vld [vmem:[%s3555_s25 + $0x8] sm:$0xff]  ;;  %v3513_v10 = vmov 0.0   ;;  %s4154_s13 = smov 48   ;;  %vm1051_vm2 = vcmask 130048   ;;  %vm1089_vm3 = vcmask 1043456  }
  0x54   : > { %3349 = vset.pattern.permute.xlu2 %v3512_v2  ;;  %3350 = vset.pattern.permute.xlu1 %v3512_v2  ;;  %s4152_s1 = sshll.u32 %s3740_s18, 3  ;;  %v3752_v8 = vand.u32 127, %v973_v7  ;;  %v3220_v12 = vld [vmem:[%s3555_s25] sm:$0xff]  ;;  %vm1071_vm4 = vcmask 64512   ;;  %v3223_v56 = vld [vmem:[%s4187_s3 + $0x8] sm:$0xff]  ;;  %vm1504_vm11 = vcmask 523264  }
  0x55   : > { %1003 = vmatpush.msra.mxu2 %v983_v1  ;;  %s966_s7 = scalar_lea.vmem %s4191_s5, %s4152_s1  ;;  %1040 = vmatpush.bf16.msra.mxu1 %v3221_v6  ;;  %v985_v13 = vld [vmem:[%s3545_s17] sm:$0xff]  ;;  %s4158_s1 = smov 112   ;;  %vm1674_vm12 = vcmask 7168  }
  0x56   : > { %v972_v4 = vld [vmem:[%s966_s7] sm:$0xff]  ;;  %s3515_s7 = smov 96   ;;  %s4156_s5 = smov 64  }
  0x57   : > { %1004 = vmatpush.msra.mxu2 %v982_v3  ;;  %976 = vperm.xlu0 %3348, %v972_v4   ;;  %v3351_v17 = vld [vmem:[%s3560_s29] ss:$0 sm:$0xff] }
  0x58   : > { %v3222_v55 = vld [vmem:[%s4187_s3] sm:$0xff]  ;;  %s3265_s3 = sshll.u32 %s3708_s0, 4 }
  0x59   : > { %1005 = vmatpush.msra.mxu2 %v981_v5  ;;  %1041 = vmatpush.bf16.msra.mxu1 %v3220_v12  ;;  %v3352_v1 = vld [vmem:[%s4192_s8] ss:$0 sm:$0xff]  ;;  %v3519_v12 = vmov 32.0  }
  0x5d   : > { %1184 = vmatpush.bf16.msrb.mxu1 %v3223_v56  ;;  %v3237_v56 = vld [vmem:[%s4186_s6 + $0x38] sm:$0xff] }
  0xc9   : > { %v977_v9 = vpop.permute.xlu0 %976 }
  0xca   : > { %vm978_vm1 = vcmp.eq.s32.totalorder %v3752_v8, %v977_v9 }
  0xcb   : > { %v2912_v11 = vsel %vm978_vm1, 1.0, %v3513_v10 }
  0xcc   : > { %2913 = vmatmul.msk.f32.vlgmr.msra.gmra.mxu2 %vm986_vm0, %v2912_v11 }
 0x14f   : > { %v1007_v14 = vpop.f32.mrf.mxu2 }
 0x150   : > { %v3759_v15 = vadd.f32 %v1007_v14, %v985_v13 }
 0x152   : > { %v1014_v16 = vpack.c.bf16 %v3759_v15, %v3759_v15 }
 0x154   : > { %2922 = vmatmul.msk.bf16.vlgmr.msra.gmra.mxu1 %vm986_vm0, %v1014_v16 }
 0x1d1   : > { %v1043_v18 = vpop.f32.mrf.mxu1 }
 0x1d2   : > { %v1044_v19 = vadd.f32 %v3351_v17, %v1043_v18 }
 0x1d4   : > { %v1047_v20 = vpack.c.bf16 %v1044_v19, %v1044_v19 }
 0x1d6   : > { %1111 = vrot.lane.b32.xlu1 %v1047_v20, %s3514_s10  ;;  %1049 = vrot.lane.b32.xlu0 %v1047_v20, %s3515_s7 }
 0x1d9   : > { %v1045_v21 = vpop.f32.mrf.mxu1 }
 0x1de   : > { %1109 = vrot.lane.b32.xlu1 %v1047_v20, %s4158_s1  ;;  %s4199_s1 = sld [smem:[#allocation15_spill]] }
 0x1e6   : > { %1084 = vrot.lane.b32.xlu1 %v1047_v20, %s4156_s5 }
 0x1ee   : > { %1144 = vrot.lane.b32.xlu1 %v1047_v20, %s4154_s13  ;;  %s4194_s13 = sshll.u32 %s3740_s18, 3  ;;  %s4197_s18 = sld [smem:[#allocation14_spill]] }
 0x1ef   : > { %s970_s5 = scalar_lea.vmem %s4193_s9, %s4194_s13  ;;  %s4196_s13 = sld [smem:[#allocation13_spill]] }
 0x248   : > { %v1112_v22 = vpop.permute.xlu1 %1111  ;;  %v1050_v23 = vpop.permute.xlu0 %1049 }
 0x249   : > { %v1056_v24 = vsel %vm1051_vm2, %v1050_v23, 0  ;;  %v1117_v25 = vsel %vm1051_vm2, %v1112_v22, 0 }
 0x24a   : > { %1065 = vmatpush.bf16.xpose.msrb.mxu2 %v1056_v24  ;;  %1126 = vmatpush.bf16.xpose.msra.mxu0 %v1117_v25 }
 0x250   : > { %v1110_v26 = vpop.permute.xlu1 %1109 }
 0x251   : > { %2923 = vmatmul.msk.bf16.vlgmr.msrb.gmra.mxu2 %vm1051_vm2, %v1047_v20  ;;  %2925 = vmatmul.msk.bf16.vlgmr.msra.gmra.mxu0 %vm1051_vm2, %v1110_v26 }
 0x252   : > { %1206 = vmatpush.bf16.msra.mxu2 %v3222_v55 }
 0x258   : > { %v1085_v27 = vpop.permute.xlu1 %1084 }
 0x259   : > { %v1091_v28 = vsel %vm1089_vm3, %v1085_v27, 0  ;;  %v3225_v27 = vld [vmem:[%s3585_s24 + $0x8] sm:$0xff] }
 0x25a   : > { %1100 = vmatpush.bf16.msra.mxu3 %v1091_v28  ;;  %1373 = vmatpush.bf16.msra.mxu1 %v3225_v27 }
 0x260   : > { %v1145_v29 = vpop.permute.xlu1 %1144 }
 0x261   : > { %v1150_v30 = vsel %vm1089_vm3, %v1145_v29, 0 }
 0x262   : > { %1159 = vmatpush.bf16.msrb.mxu3 %v1150_v30 }
 0x2ce   : > { %v1128_v31 = vpop.f32.mrf.mxu0 }
 0x2cf   : > { %v1132_v36 = vsel %vm1071_vm4, %v1128_v31, -inf }
 0x2d4   : > { %v1067_v32 = vpop.f32.mrf.mxu2 }
 0x2d5   : > { %v1072_v33 = vsel %vm1071_vm4, %v1067_v32, -inf }
 0x2d6   : > { %v1130_v34 = vpop.f32.mrf.mxu0  ;;  %1073 = vmax.xlane.f32.xlu2 %v1072_v33 }
 0x2dc   : > { %v1069_v35 = vpop.f32.mrf.mxu2 }
 0x2dd   : > { %v3799_v35 = vadd.s32 1, %v3752_v8 }
 0x2de   : > { %1133 = vmax.xlane.f32.xlu2 %v1132_v36 }
 0x349   : > { %v1074_v37 = vpop.xlane.xlu2 %1073 }
 0x34a   : > { %v1075_v38 = vsub.f32 %v1067_v32, %v1074_v37  ;;  %v3353_v37 = vld [vmem:[%s3575_s14] ss:$0 sm:$0xff] }
 0x34c   : > { %v1076_v39 = vmul.f32 1.442695, %v1075_v38 }
 0x34e   : > { %3367 = vpow2.f32 %v1076_v39 }
 0x351   : > { %v1134_v40 = vpop.xlane.xlu2 %1133 }
 0x352   : > { %v1135_v41 = vsub.f32 %v1128_v31, %v1134_v40  ;;  %v3796_v31 = vshrl.u32 %v973_v7, 7  ;;  %v3354_v40 = vld [vmem:[%s3580_s19] ss:$0 sm:$0xff] }
 0x354   : > { %v3368_v42 = vpop.eup %3367  ;;  %v1136_v43 = vmul.f32 1.442695, %v1135_v41  ;;  %v1263_v36 = vadd.s32 1, %v3796_v31  ;;  %vm1260_vm9 = vcmp.eq.s32.totalorder %v3796_v31, %v3799_v35  ;;  %vm1651_vm13 = vcmp.le.s32.totalorder %v3796_v31, %v3752_v8 }
 0x355   : > { %v1078_v44 = vsel %vm1071_vm4, %v3368_v42, 0.0  ;;  %vm1664_vm14 = vcmp.lt.s32.totalorder %v3796_v31, %v3752_v8 }
 0x356   : > { %3369 = vpow2.f32 %v1136_v43  ;;  %1079 = vadd.xlane.f32.xlu0 %v1078_v44  ;;  %vm1264_vm10 = vcmp.eq.s32.totalorder %v1263_v36, %v3752_v8  ;;  %v3227_v44 = vld [vmem:[%s3585_s24 + $0x18] sm:$0xff] }
 0x357   : > { %v3813_v43 = vsel %vm1264_vm10, 1.0, %v3513_v10 }
 0x35c   : > { %v3370_v45 = vpop.eup %3369 }
 0x35d   : > { %v1138_v46 = vsel %vm1071_vm4, %v3370_v45, 0.0 }
 0x35e   : > { %1139 = vadd.xlane.f32.xlu2 %v1138_v46 }
 0x3c9   : > { %v1080_v47 = vpop.xlane.xlu0 %1079 }
 0x3ca   : > { %3371 = vrcp.f32 %v1080_v47  ;;  %v3224_v47 = vld [vmem:[%s3585_s24] sm:$0xff] }
 0x3cb   : > { %1374 = vmatpush.bf16.msra.mxu1 %v3224_v47 }
 0x3d0   : > { %v3372_v48 = vpop.eup %3371 }
 0x3d1   : > { %v1082_v49 = vmul.f32 %v3372_v48, %v3368_v42  ;;  %v1140_v50 = vpop.xlane.xlu2 %1139  ;;  %v3810_v42 = vsel %vm1260_vm9, 1.0, %v3513_v10  ;;  %v3229_v48 = vld [vmem:[%s3585_s24 + $0x28] sm:$0xff] }
 0x3d2   : > { %3373 = vrcp.f32 %v1140_v50  ;;  %1407 = vmatpush.bf16.msrb.mxu2 %v3229_v48 }
 0x3d3   : > { %v1083_v51 = vpack.c.bf16 %v1082_v49, %v1082_v49  ;;  %3375 = vrcp.f32 %v3519_v12  ;;  %v3228_v49 = vld [vmem:[%s3585_s24 + $0x20] sm:$0xff]  ;;  %v3231_v12 = vld [vmem:[%s4186_s6 + $0x8] sm:$0xff] }
 0x3d5   : > { %2924 = vmatmul.msk.bf16.vlgmr.msra.gmra.mxu3 %vm1071_vm4, %v1083_v51 }
 0x3d6   : > { %1408 = vmatpush.bf16.msrb.mxu2 %v3228_v49 }
 0x3d8   : > { %v3374_v52 = vpop.eup %3373 }
 0x3d9   : > { %v1142_v53 = vmul.f32 %v3374_v52, %v3370_v45  ;;  %v3376_v13 = vpop.eup %3375  ;;  %v3226_v45 = vld [vmem:[%s3585_s24 + $0x10] sm:$0xff] }
 0x3da   : > { %v1224_v14 = vmul.f32 32.0, %v3376_v13  ;;  %vm1228_vm5 = vweird.f32 %v3376_v13 }
 0x3db   : > { %v1143_v54 = vpack.c.bf16 %v1142_v53, %v1142_v53 }
 0x3dc   : > { %v1225_v16 = vsub.f32 1.0, %v1224_v14  ;;  %v3230_v14 = vld [vmem:[%s4186_s6] sm:$0xff] }
 0x3de   : > { %v1226_v17 = vmul.f32 %v3376_v13, %v1225_v16  ;;  %v3240_v16 = vld [vmem:[%s4186_s6 + $0x50] sm:$0xff] }
 0x3e0   : > { %v1227_v18 = vadd.f32 %v3376_v13, %v1226_v17  ;;  %v3239_v17 = vld [vmem:[%s4186_s6 + $0x48] sm:$0xff] }
 0x3e2   : > { %v3789_v19 = vsel %vm1228_vm5, %v3376_v13, %v1227_v18  ;;  %v3241_v13 = vld [vmem:[%s4186_s6 + $0x58] sm:$0xff]  ;;  %v3238_v18 = vld [vmem:[%s4186_s6 + $0x40] sm:$0xff] }
 0x3e5   : > { %2926 = vmatmul.msk.bf16.vlgmr.msrb.gmra.mxu3 %vm1071_vm4, %v1143_v54 }
 0x458   : > { %v1102_v57 = vpop.f32.mrf.mxu3 }
 0x459   : > { %v1108_v58 = vpack.c.bf16 %v1102_v57, %v1102_v57  ;;  %v3236_v57 = vld [vmem:[%s4186_s6 + $0x30] sm:$0xff] }
 0x45b   : > { %2936 = vmatmul.msk.bf16.vlgmr.msra.gmra.mxu2 %vm1051_vm2, %v1108_v58  ;;  %v3235_v58 = vld [vmem:[%s4186_s6 + $0x28] sm:$0xff] }
 0x45c   : > { %1602 = vmatpush.bf16.msra.mxu2 %v3241_v13 }
 0x460   : > { %v1104_v59 = vpop.f32.mrf.mxu3  ;;  %1603 = vmatpush.bf16.msra.mxu2 %v3240_v16 }
 0x461   : > { %v3234_v59 = vld [vmem:[%s4186_s6 + $0x20] sm:$0xff] }
 0x464   : > { %1604 = vmatpush.bf16.msra.mxu2 %v3239_v17 }
 0x468   : > { %v1161_v60 = vpop.f32.mrf.mxu3  ;;  %1605 = vmatpush.bf16.msra.mxu2 %v3238_v18 }
 0x469   : > { %v1167_v61 = vpack.c.bf16 %v1161_v60, %v1161_v60  ;;  %v3233_v60 = vld [vmem:[%s4186_s6 + $0x18] sm:$0xff] }
 0x46b   : > { %2931 = vmatmul.msk.bf16.vlgmr.msrb.gmra.mxu1 %vm1051_vm2, %v1167_v61  ;;  %v3232_v61 = vld [vmem:[%s4186_s6 + $0x10] sm:$0xff]  ;;  %s2796_s6 = scalar_lea.hbm %s3685_s20, %s3265_s3  ;;  %s3437_s3 = scalar_lea.hbm %s3685_s20, 32 }
 0x46c   : > { %1552 = vmatpush.bf16.msrb.mxu1 %v3233_v60 }
 0x470   : > { %v1163_v62 = vpop.f32.mrf.mxu3  ;;  %1553 = vmatpush.bf16.msrb.mxu1 %v3232_v61 }
 0x474   : > { %1554 = vmatpush.bf16.msrb.mxu1 %v3231_v12 }
 0x478   : > { %1555 = vmatpush.bf16.msrb.mxu1 %v3230_v14 }
 0x4de   : > { %v1208_v63 = vpop.f32.mrf.mxu2 }
 0x4e6   : > { %v1210_v0 = vpop.f32.mrf.mxu2 }
 0x4e8   : > { %v1186_v3 = vpop.f32.mrf.mxu1 }
 0x4e9   : > { %v1209_v4 = vadd.f32 %v1208_v63, %v1186_v3 }
 0x4eb   : > { %v1216_v5 = vadd.f32 %v3352_v1, %v1209_v4  ;;  %v3355_v1 = vld [vmem:[%s3590_s30] ss:$0 sm:$0xff] }
 0x4ed   : > { %v1217_v6 = vadd.f32 %v1216_v5, %v3759_v15 }
 0x4ef   : > { %v1220_v9 = vsel %vm986_vm0, %v1217_v6, 0.0 }
 0x4f0   : > { %v1188_v11 = vpop.f32.mrf.mxu1  ;;  %1221 = vadd.xlane.f32.xlu2 %v1220_v9 }
 0x563   : > { %v1222_v20 = vpop.xlane.xlu2 %1221 }
 0x564   : > { %v1230_v21 = vmul.f32 %v3789_v19, %v1222_v20 }
 0x566   : > { %v1231_v22 = vsub.f32 %v1217_v6, %v1230_v21 }
 0x568   : > { %v1232_v15 = vmul.f32 %v1231_v22, %v1231_v22 }
 0x56a   : > { %v1233_v23 = vsel %vm986_vm0, %v1232_v15, 0.0 }
 0x56b   : > { %1234 = vadd.xlane.f32.xlu1 %v1233_v23 }
 0x5de   : > { %v1235_v24 = vpop.xlane.xlu1 %1234 }
 0x5df   : > { %v1236_v25 = vmul.f32 %v1235_v24, %v3789_v19 }
 0x5e1   : > { %v1237_v26 = vadd.f32 1e-05, %v1236_v25 }
 0x5e3   : > { %3377 = vrsqrt.f32 %v1237_v26  ;;  %vm1244_vm7 = vweird.f32 %v1237_v26 }
 0x5e9   : > { %v3378_v28 = vpop.eup %3377 }
 0x5ea   : > { %v1239_v29 = vmul.f32 %v3378_v28, %v1237_v26  ;;  %vm1245_vm6 = vweird.f32 %v3378_v28 }
 0x5eb   : > { %vm1246_vm8 = vmor %vm1244_vm7, %vm1245_vm6 }
 0x5ec   : > { %v1240_v30 = vmul.f32 %v3378_v28, %v1239_v29 }
 0x5ee   : > { %v1241_v32 = vmul.f32 0.5, %v1240_v30 }
 0x5f0   : > { %v1242_v33 = vsub.f32 1.5, %v1241_v32 }
 0x5f2   : > { %v1243_v34 = vmul.f32 %v3378_v28, %v1242_v33 }
 0x5f4   : > { %v1247_v38 = vsel %vm1246_vm8, %v3378_v28, %v1243_v34  ;;  %v3356_v28 = vld [vmem:[%s3600_s12] ss:$0 sm:$0xff] }
 0x5f5   : > { %v1248_v39 = vmul.f32 %v1247_v38, %v1231_v22 }
 0x5f7   : > { %v1252_v7 = vmul.f32 %v3353_v37, %v1248_v39  ;;  %v1650_v37 = vld [vmem:[%s970_s5] sm:$0xff]  ;;  %s4195_s5 = sld [smem:[#allocation12_spill]] }
 0x5f8   : > { %v1675_v38 = vsel %vm1674_vm12, %v1650_v37, 0 }
 0x5f9   : > { %v3807_v41 = vadd.f32 %v3354_v40, %v1252_v7  ;;  %v1677_v40 = vshrl.u32 %v1675_v38, 16 }
 0x5fb   : > { %1285 = vmatpush.msrb.mxu0 %v3807_v41  ;;  %1308 = vmatpush.msra.mxu3 %v3807_v41  ;;  %v1323_v46 = vpack.c.bf16 %v3807_v41, %v3807_v41 }
 0x5fc   : > { %2939 = vmatmul.msk.f32.vlgmr.msrb.gmra.mxu0 %vm1071_vm4, %v3810_v42  ;;  %2940 = vmatmul.msk.f32.vlgmr.msra.gmra.mxu3 %vm1071_vm4, %v3813_v43 }
 0x5fd   : > { %1345 = vmatpush.bf16.msra.mxu0 %v3227_v44  ;;  %v1679_v44 = vcvt.s32.f32 %v1677_v40  ;;  %v3357_v17 = vld [vmem:[%s4195_s5] ss:$0 sm:$0xff]  ;;  %s4198_s5 = sld [smem:[#allocation8_spill]] }
 0x5ff   : > { %1682 = vadd.xlane.f32.xlu0 %v1679_v44  ;;  %v3243_v44 = vld [vmem:[%s4197_s18 + $0x8] sm:$0xff] }
 0x601   : > { %1346 = vmatpush.bf16.msra.mxu0 %v3226_v45 }
 0x604   : > { %2953 = vmatmul.msk.bf16.vlgmr.msra.gmra.mxu0 %vm986_vm0, %v1323_v46  ;;  %v1676_v46 = vand.u32 65535, %v1675_v38 }
 0x605   : > { %1512 = vmatpush.bf16.msrb.mxu0 %v3237_v56 }
 0x606   : > { %v1678_v48 = vcvt.s32.f32 %v1676_v46 }
 0x608   : > { %1680 = vadd.xlane.f32.xlu0 %v1678_v48  ;;  %v1726_v48 = vld [vmem:[%s4198_s5 + $0x8] sm:$0xff] }
 0x609   : > { %1513 = vmatpush.bf16.msrb.mxu0 %v3236_v57 }
 0x60d   : > { %1514 = vmatpush.bf16.msrb.mxu0 %v3235_v58 }
 0x611   : > { %1515 = vmatpush.bf16.msrb.mxu0 %v3234_v59 }
 0x615   : > { %1800 = vmatpush.bf16.msra.mxu0 %v3243_v44 }
 0x679   : > { %v1287_v50 = vpop.f32.mrf.mxu0 }
 0x67a   : > { %v1317_v51 = vpack.c.bf16 %v1287_v50, %v1287_v50 }
 0x67c   : > { %2962 = vmatmul.msk.bf16.vlgmr.msra.gmra.mxu1 %vm986_vm0, %v1317_v51 }
 0x67f   : > { %v1310_v52 = vpop.f32.mrf.mxu3 }
 0x680   : > { %v1385_v53 = vpack.c.bf16 %v1310_v52, %v1310_v52  ;;  %v1652_v52 = vsel %vm1651_vm13, 1, %v3512_v2 }
 0x681   : > { %v1348_v54 = vpop.f32.mrf.mxu0 }
 0x682   : > { %2975 = vmatmul.msk.bf16.vlgmr.msrb.gmra.mxu2 %vm986_vm0, %v1385_v53  ;;  %v1665_v53 = vsel %vm1664_vm14, 1, %v3512_v2 }
 0x689   : > { %v1350_v55 = vpop.f32.mrf.mxu0 }
 0x6f9   : > { %v1376_v62 = vpop.f32.mrf.mxu1 }
 0x6fa   : > { %v1377_v0 = vadd.f32 %v1376_v62, %v1348_v54 }
 0x701   : > { %v1378_v63 = vpop.f32.mrf.mxu1 }
 0x705   : > { %v1410_v3 = vpop.f32.mrf.mxu2 }
 0x706   : > { %v1414_v4 = vadd.f32 %v1410_v3, %v1377_v0  ;;  %v1683_v3 = vpop.xlane.xlu0 %1682 }
 0x707   : > { %v1685_v2 = vcvt.f32.s32 %v1683_v3 }
 0x708   : > { %v1419_v5 = vadd.f32 %v3355_v1, %v1414_v4 }
 0x709   : > { %v1686_v18 = vshll.u32 %v1685_v2, 16 }
 0x70a   : > { %v1420_v6 = vmax.f32 %v1419_v5, 0.0 }
 0x70c   : > { %v1479_v9 = vpack.c.bf16 %v1420_v6, %v1420_v6  ;;  %1436 = vmatpush.msrb.mxu3 %v1420_v6 }
 0x70d   : > { %v1412_v11 = vpop.f32.mrf.mxu2  ;;  %2976 = vmatmul.msk.f32.vlgmr.msrb.gmra.mxu3 %vm1071_vm4, %v3810_v42 }
 0x70e   : > { %1456 = vmatpush.msra.mxu3 %v1420_v6  ;;  %3002 = vmatmul.msk.bf16.vlgmr.msrb.gmra.mxu0 %vm1504_vm11, %v1479_v9 }
 0x715   : > { %2977 = vmatmul.msk.f32.vlgmr.msra.gmra.mxu3 %vm1071_vm4, %v3813_v43 }
 0x78b   : > { %v1517_v20 = vpop.f32.mrf.mxu0 }
 0x790   : > { %v1438_v21 = vpop.f32.mrf.mxu3 }
 0x791   : > { %v1469_v22 = vpack.c.bf16 %v1438_v21, %v1438_v21 }
 0x793   : > { %v1519_v15 = vpop.f32.mrf.mxu0  ;;  %3019 = vmatmul.msk.bf16.vlgmr.msrb.gmra.mxu1 %vm1504_vm11, %v1469_v22 }
 0x794   : > { %v1681_v15 = vpop.xlane.xlu0 %1680 }
 0x798   : > { %v1458_v23 = vpop.f32.mrf.mxu3 }
 0x799   : > { %v1570_v24 = vpack.c.bf16 %v1458_v23, %v1458_v23 }
 0x79b   : > { %3044 = vmatmul.msk.bf16.vlgmr.msra.gmra.mxu2 %vm1504_vm11, %v1570_v24  ;;  %v3358_v24 = vld [vmem:[%s4196_s13] ss:$0 sm:$0xff] }
 0x810   : > { %v1557_v25 = vpop.f32.mrf.mxu1 }
 0x811   : > { %v1558_v27 = vadd.f32 %v1557_v25, %v1517_v20  ;;  %v1684_v25 = vcvt.f32.s32 %v1681_v15 }
 0x818   : > { %v1559_v26 = vpop.f32.mrf.mxu1 }
 0x81e   : > { %v1607_v29 = vpop.f32.mrf.mxu2 }
 0x81f   : > { %v1611_v30 = vadd.f32 %v1607_v29, %v1558_v27  ;;  %v1687_v27 = vadd.s32 %v1686_v18, %v1684_v25  ;;  %v3873_v29 = vadd.s32 8, %v3796_v31 }
 0x821   : > { %v1616_v32 = vadd.f32 %v3356_v28, %v1611_v30  ;;  %v1688_v30 = vrot.slane %v1687_v27, 4 }
 0x823   : > { %v1617_v33 = vadd.f32 %v1616_v32, %v3807_v41 }
 0x825   : > { %v1620_v34 = vsel %vm986_vm0, %v1617_v33, 0.0 }
 0x826   : > { %1621 = vadd.xlane.f32.xlu2 %v1620_v34  ;;  %v1609_v36 = vpop.f32.mrf.mxu2 }
 0x899   : > { %v1622_v39 = vpop.xlane.xlu2 %1621 }
 0x89a   : > { %v1623_v7 = vmul.f32 %v1622_v39, %v3789_v19 }
 0x89c   : > { %v1624_v45 = vsub.f32 %v1617_v33, %v1623_v7  ;;  %v1689_v33 = vadd.s32 %v1688_v30, %v1687_v27 }
 0x89e   : > { %v1625_v47 = vmul.f32 %v1624_v45, %v1624_v45  ;;  %v1690_v34 = vrot.slane %v1689_v33, 2 }
 0x8a0   : > { %v1626_v41 = vsel %vm986_vm0, %v1625_v47, 0.0  ;;  %v1691_v36 = vadd.s32 %v1690_v34, %v1689_v33 }
 0x8a1   : > { %1627 = vadd.xlane.f32.xlu2 %v1626_v41  ;;  %v1725_v41 = vld [vmem:[%s4198_s5] sm:$0xff] }
 0x8a2   : > { %v1692_v38 = vrot.slane %v1691_v36, 1 }
 0x8a4   : > { %v1693_v40 = vadd.s32 %v1692_v38, %v1691_v36 }
 0x8a6   : > { %3266 = vpush %v1693_v40 }
 0x8b9   : > { %1654 = vperm.xlu2 %3349, %v1650_v37   ;;  %v3880_v37 = vadd.s32 16, %v3796_v31 }
 0x8d7   : > { %s3267_s13 = spop %3266 }
 0x8d8   : > { %v1712_v47 = vstv %s3267_s13  ;;  %s4200_s13 = smov 112  }
 0x914   : > { %v1628_v49 = vpop.xlane.xlu2 %1627 }
 0x915   : > { %v1629_v50 = vmul.f32 %v1628_v49, %v3789_v19 }
 0x917   : > { %v1630_v51 = vadd.f32 1e-05, %v1629_v50 }
 0x919   : > { %3379 = vrsqrt.f32 %v1630_v51  ;;  %vm1637_vm1 = vweird.f32 %v1630_v51 }
 0x91c   : > { %v1655_v54 = vpop.permute.xlu2 %1654 }
 0x91d   : > { %v1656_v55 = vmul.u32 %v1655_v54, %v1652_v52  ;;  %v1666_v56 = vmul.u32 %v1665_v53, %v1655_v54 }
 0x91f   : > { %v3380_v57 = vpop.eup %3379  ;;  %v1657_v58 = vsel %vm1071_vm4, %v1656_v55, 0  ;;  %v1667_v59 = vsel %vm1071_vm4, %v1666_v56, 0  ;;  %v1727_v56 = vld [vmem:[%s4198_s5 + $0x10] sm:$0xff] }
 0x920   : > { %v1632_v60 = vmul.f32 %v3380_v57, %v1630_v51  ;;  %v1658_v61 = vrot.slane %v1657_v58, 4  ;;  %v1668_v62 = vrot.slane %v1667_v59, 4  ;;  %vm1638_vm15 = vweird.f32 %v3380_v57 }
 0x921   : > { %vm1639_vm5 = vmor %vm1637_vm1, %vm1638_vm15  ;;  %vm1713_vm1 = vcmp.lt.s32.totalorder %v3796_v31, %v1712_v47 }
 0x922   : > { %v1633_v63 = vmul.f32 %v3380_v57, %v1632_v60  ;;  %v1659_v0 = vadd.s32 %v1658_v61, %v1657_v58  ;;  %v1669_v1 = vadd.s32 %v1668_v62, %v1667_v59  ;;  %v3895_v52 = vsel %vm1713_vm1, 1.0, %v3513_v10 }
 0x923   : > { %vm2186_vm1 = vcmp.eq.s32.totalorder %v3873_v29, %v3799_v35 }
 0x924   : > { %v1634_v4 = vmul.f32 0.5, %v1633_v63  ;;  %v1660_v5 = vrot.slane %v1659_v0, 2  ;;  %v1670_v6 = vrot.slane %v1669_v1, 2  ;;  %v3359_v63 = vld [vmem:[%s4199_s1] ss:$0 sm:$0xff]  ;;  %s4201_s1 = smov 64  }
 0x926   : > { %v1635_v9 = vsub.f32 1.5, %v1634_v4  ;;  %v1661_v11 = vadd.s32 %v1660_v5, %v1659_v0  ;;  %v1671_v12 = vadd.s32 %v1670_v6, %v1669_v1 }
 0x928   : > { %v1636_v13 = vmul.f32 %v3380_v57, %v1635_v9  ;;  %v1662_v14 = vrot.slane %v1661_v11, 1  ;;  %v1672_v16 = vrot.slane %v1671_v12, 1 }
 0x92a   : > { %v1640_v20 = vsel %vm1639_vm5, %v3380_v57, %v1636_v13  ;;  %v1663_v21 = vadd.s32 %v1662_v14, %v1661_v11  ;;  %v1673_v22 = vadd.s32 %v1672_v16, %v1671_v12  ;;  %vm1714_vm5 = vcmp.lt.s32.totalorder %v3873_v29, %v1712_v47 }
 0x92b   : > { %v1641_v23 = vmul.f32 %v1640_v20, %v1624_v45  ;;  %v3242_v45 = vld [vmem:[%s4197_s18] sm:$0xff]  ;;  %v3898_v53 = vsel %vm1714_vm5, 1.0, %v3513_v10 }
 0x92c   : > { %vm1697_vm6 = vcmp.ge.s32.totalorder %v3796_v31, %v1673_v22  ;;  %vm1700_vm7 = vcmp.lt.s32.totalorder %v3796_v31, %v1663_v21  ;;  %vm1698_vm9 = vcmp.ge.s32.totalorder %v3873_v29, %v1673_v22  ;;  %vm1701_vm10 = vcmp.lt.s32.totalorder %v3873_v29, %v1663_v21  ;;  %1801 = vmatpush.bf16.msra.mxu0 %v3242_v45 }
 0x92d   : > { %v1645_v26 = vmul.f32 %v3357_v17, %v1641_v23  ;;  %vm1703_vm8 = vmand %vm1697_vm6, %vm1700_vm7  ;;  %vm1699_vm13 = vcmp.ge.s32.totalorder %v3880_v37, %v1673_v22  ;;  %vm1702_vm14 = vcmp.lt.s32.totalorder %v3880_v37, %v1663_v21  ;;  %vm1722_vm6 = vcmp.lt.s32.totalorder %v3752_v8, %v1712_v47 }
 0x92e   : > { %v3045_v32 = vsel %vm1703_vm8, 1.0, %v3513_v10  ;;  %vm1704_vm12 = vmand %vm1698_vm9, %vm1701_vm10  ;;  %v3943_v15 = vsel %vm1722_vm6, 1.0, %v3513_v10  ;;  %vm1852_vm7 = vcmask 195584  }
 0x92f   : > { %v1649_v28 = vadd.f32 %v3358_v24, %v1645_v26  ;;  %v3046_v39 = vsel %vm1704_vm12, 1.0, %v3513_v10  ;;  %vm1705_vm15 = vmand %vm1699_vm13, %vm1702_vm14  ;;  %v3065_v23 = vadd.f32 -1.0, %v3943_v15 }
 0x930   : > { %v3047_v7 = vsel %vm1705_vm15, 1.0, %v3513_v10 }
 0x931   : > { %1752 = vmatpush.msrb.mxu3 %v1649_v28  ;;  %v1813_v24 = vmul.f32 1e+09, %v3065_v23 }
 0x932   : > { %3052 = vmatmul.msk.f32.vlgmr.msrb.gmra.mxu3 %vm1071_vm4, %v3045_v32 }
 0x93a   : > { %3053 = vmatmul.msk.f32.gmra.mxu3 %vm1071_vm4, %v3046_v39 }
 0x942   : > { %3054 = vmatmul.msk.f32.gmra.mxu3 %vm1071_vm4, %v3047_v7  ;;  %vm1715_vm4 = vcmp.lt.s32.totalorder %v3880_v37, %v1712_v47 }
 0x943   : > { %v3912_v59 = vsel %vm1715_vm4, 1.0, %v3513_v10  ;;  %vm2187_vm4 = vcmp.eq.s32.totalorder %v3880_v37, %v3799_v35 }
 0x9b5   : > { %v1754_v46 = vpop.f32.mrf.mxu3 }
 0x9b6   : > { %v1755_v49 = vadd.f32 %v1754_v46, %v1725_v41 }
 0x9b8   : > { %v3901_v54 = vmul.f32 %v3895_v52, %v1755_v49 }
 0x9bd   : > { %v1757_v50 = vpop.f32.mrf.mxu3 }
 0x9be   : > { %v1758_v51 = vadd.f32 %v1757_v50, %v1726_v48 }
 0x9c0   : > { %v3904_v55 = vmul.f32 %v3898_v53, %v1758_v51 }
 0x9c2   : > { %v1770_v31 = vpack.c.bf16 %v3904_v55, %v3901_v54 }
 0x9c4   : > { %3063 = vmatmul.msk.bf16.vlgmr.msra.gmra.mxu0 %vm986_vm0, %v1770_v31 }
 0x9c5   : > { %v1760_v57 = vpop.f32.mrf.mxu3 }
 0x9c6   : > { %v1761_v58 = vadd.f32 %v1760_v57, %v1727_v56 }
 0x9c8   : > { %v3915_v60 = vmul.f32 %v3912_v59, %v1761_v58 }
 0x9ca   : > { %v1771_v61 = vpack.c.bf16 %v3915_v60, %v3915_v60 }
 0x9d4   : > { %3064 = vmatmul.msk.bf16.gmra.mxu0 %vm986_vm0, %v1771_v61 }
 0xa41   : > { %v1803_v62 = vpop.f32.mrf.mxu0 }
 0xa42   : > { %v1804_v1 = vadd.f32 %v3359_v63, %v1803_v62 }
 0xa49   : > { %v1805_v0 = vpop.f32.mrf.mxu0 }
 0xa4a   : > { %v1806_v3 = vadd.f32 %v3359_v63, %v1805_v0 }
 0xa4c   : > { %v3921_v4 = vpack.c.bf16 %v1806_v3, %v1804_v1 }
 0xa4e   : > { %1818 = vrot.lane.b32.xlu1 %v3921_v4, %s3515_s7 }
 0xa51   : > { %v1808_v5 = vpop.f32.mrf.mxu0 }
 0xa52   : > { %v1809_v6 = vadd.f32 %v3359_v63, %v1808_v5 }
 0xa54   : > { %v1815_v2 = vpack.c.bf16 %v1809_v6, %v1809_v6 }
 0xa56   : > { %1930 = vrot.lane.b32.xlu0 %v1815_v2, %s3514_s10  ;;  %1820 = vrot.lane.b32.xlu2 %v1815_v2, %s3515_s7  ;;  %s4203_s7 = sld [smem:[#allocation16_spill]] }
 0xa59   : > { %v1810_v9 = vpop.f32.mrf.mxu0 }
 0xa5e   : > { %1926 = vrot.lane.b32.xlu0 %v1815_v2, %s4200_s13  ;;  %1928 = vrot.lane.b32.xlu2 %v3921_v4, %s3514_s10  ;;  %s4202_s10 = smov 48  }
 0xa66   : > { %1924 = vrot.lane.b32.xlu2 %v3921_v4, %s4200_s13  ;;  %s4204_s13 = sld [smem:[#allocation17_spill]] }
 0xab0   : > { %v1821_v11 = vpop.permute.xlu2 %1820 }
 0xab1   : > { %v1832_v12 = vsel %vm1051_vm2, %v1821_v11, 0 }
 0xab2   : > { %1840 = vmatpush.bf16.xpose.msra.mxu1 %v1832_v12 }
 0xab8   : > { %v1929_v18 = vpop.permute.xlu2 %1928 }
 0xab9   : > { %v1939_v20 = vsel %vm1051_vm2, %v1929_v18, 0 }
 0xac0   : > { %v1819_v13 = vpop.permute.xlu1 %1818  ;;  %v1925_v21 = vpop.permute.xlu2 %1924 }
 0xac1   : > { %v1829_v14 = vsel %vm1051_vm2, %v1819_v13, 0 }
 0xac2   : > { %1841 = vmatpush.bf16.xpose.msra.mxu1 %v1829_v14 }
 0xac8   : > { %v1931_v16 = vpop.permute.xlu0 %1930 }
 0xac9   : > { %v1942_v17 = vsel %vm1051_vm2, %v1931_v16, 0  ;;  %3066 = vmatmul.msk.bf16.vlgmr.msra.gmra.mxu1 %vm1051_vm2, %v3921_v4 }
 0xaca   : > { %1950 = vmatpush.bf16.xpose.msra.mxu3 %v1942_v17 }
 0xad0   : > { %v1927_v22 = vpop.permute.xlu0 %1926 }
 0xad2   : > { %1951 = vmatpush.bf16.xpose.msra.mxu3 %v1939_v20 }
 0xad9   : > { %3067 = vmatmul.msk.bf16.gmra.mxu1 %vm1051_vm2, %v1815_v2  ;;  %3070 = vmatmul.msk.bf16.vlgmr.msra.gmra.mxu3 %vm1051_vm2, %v1925_v21 }
 0xae9   : > { %3071 = vmatmul.msk.bf16.gmra.mxu3 %vm1051_vm2, %v1927_v22 }
 0xb46   : > { %v1843_v25 = vpop.f32.mrf.mxu1 }
 0xb47   : > { %v1844_v26 = vadd.f32 %v1843_v25, %v1813_v24 }
 0xb49   : > { %v1853_v27 = vsel %vm1852_vm7, %v1844_v26, -inf }
 0xb4a   : > { %1854 = vmax.xlane.f32.xlu2 %v1853_v27 }
 0xb4e   : > { %v1845_v28 = vpop.f32.mrf.mxu1 }
 0xb4f   : > { %v1846_v30 = vadd.f32 %v1845_v28, %v1813_v24 }
 0xb51   : > { %v1856_v32 = vsel %vm1852_vm7, %v1846_v30, -inf }
 0xb52   : > { %1857 = vmax.xlane.f32.xlu1 %v1856_v32 }
 0xb56   : > { %v1848_v33 = vpop.f32.mrf.mxu1 }
 0xb57   : > { %v1849_v34 = vadd.f32 %v1848_v33, %v1813_v24 }
 0xb59   : > { %v1859_v36 = vsel %vm1852_vm7, %v1849_v34, -inf }
 0xb5a   : > { %1860 = vmax.xlane.f32.xlu1 %v1859_v36 }
 0xb5c   : > { %v1953_v38 = vpop.f32.mrf.mxu3 }
 0xb5d   : > { %v1954_v39 = vadd.f32 %v1953_v38, %v1813_v24 }
 0xb5e   : > { %v1850_v40 = vpop.f32.mrf.mxu1 }
 0xb5f   : > { %v1962_v7 = vsel %vm1852_vm7, %v1954_v39, -inf }
 0xb60   : > { %1963 = vmax.xlane.f32.xlu0 %v1962_v7 }
 0xb64   : > { %v1955_v44 = vpop.f32.mrf.mxu3 }
 0xb65   : > { %v1956_v45 = vadd.f32 %v1955_v44, %v1813_v24 }
 0xb67   : > { %v1965_v46 = vsel %vm1852_vm7, %v1956_v45, -inf }
 0xb68   : > { %1966 = vmax.xlane.f32.xlu2 %v1965_v46 }
 0xb6c   : > { %v1958_v47 = vpop.f32.mrf.mxu3 }
 0xb6d   : > { %v1959_v48 = vadd.f32 %v1958_v47, %v1813_v24 }
 0xb6f   : > { %v1968_v49 = vsel %vm1852_vm7, %v1959_v48, -inf }
 0xb74   : > { %v1960_v41 = vpop.f32.mrf.mxu3  ;;  %1890 = vrot.lane.b32.xlu0 %v1815_v2, %s4201_s1 }
 0xb9e   : > { %1969 = vmax.xlane.f32.xlu0 %v1968_v49 }
 0xbb2   : > { %1999 = vrot.lane.b32.xlu0 %v1815_v2, %s4202_s10 }
 0xbbd   : > { %v1855_v50 = vpop.xlane.xlu2 %1854 }
 0xbbe   : > { %v1862_v51 = vsub.f32 %v1844_v26, %v1855_v50 }
 0xbc0   : > { %v1865_v31 = vmul.f32 1.442695, %v1862_v51 }
 0xbc2   : > { %3381 = vpow2.f32 %v1865_v31 }
 0xbc5   : > { %v1858_v58 = vpop.xlane.xlu1 %1857 }
 0xbc6   : > { %v1863_v63 = vsub.f32 %v1846_v30, %v1858_v58 }
 0xbc8   : > { %v3382_v56 = vpop.eup %3381  ;;  %v1867_v1 = vmul.f32 1.442695, %v1863_v63 }
 0xbc9   : > { %v1871_v57 = vsel %vm1852_vm7, %v3382_v56, 0.0 }
 0xbca   : > { %1872 = vadd.xlane.f32.xlu2 %v1871_v57 }
 0xbcd   : > { %v1861_v18 = vpop.xlane.xlu1 %1860 }
 0xbce   : > { %v1864_v20 = vsub.f32 %v1849_v34, %v1861_v18 }
 0xbd0   : > { %v1869_v21 = vmul.f32 1.442695, %v1864_v20 }
 0xbd3   : > { %v1964_v61 = vpop.xlane.xlu0 %1963 }
 0xbd4   : > { %v1971_v62 = vsub.f32 %v1954_v39, %v1964_v61 }
 0xbd6   : > { %v1974_v0 = vmul.f32 1.442695, %v1971_v62 }
 0xbd8   : > { %3383 = vpow2.f32 %v1974_v0  ;;  %v3244_v0 = vld [vmem:[%s4203_s7] sm:$0xff] }
 0xbd9   : > { %3385 = vpow2.f32 %v1867_v1  ;;  %v3245_v1 = vld [vmem:[%s4203_s7 + $0x8] sm:$0xff] }
 0xbda   : > { %2052 = vmatpush.bf16.msrb.mxu1 %v3245_v1 }
 0xbdb   : > { %v1967_v3 = vpop.xlane.xlu2 %1966 }
 0xbdc   : > { %v1972_v6 = vsub.f32 %v1956_v45, %v1967_v3 }
 0xbde   : > { %v3384_v5 = vpop.eup %3383  ;;  %v1976_v9 = vmul.f32 1.442695, %v1972_v6 }
 0xbdf   : > { %v1980_v2 = vsel %vm1852_vm7, %v3384_v5, 0.0  ;;  %v3386_v11 = vpop.eup %3385 }
 0xbe0   : > { %1981 = vadd.xlane.f32.xlu1 %v1980_v2  ;;  %3387 = vpow2.f32 %v1976_v9  ;;  %v1874_v14 = vsel %vm1852_vm7, %v3386_v11, 0.0 }
 0xbe1   : > { %3389 = vpow2.f32 %v1869_v21  ;;  %v3360_v21 = vld [vmem:[%s4204_s13] ss:$0 sm:$0xff]  ;;  %s4207_s13 = sld [smem:[#allocation19_spill]] }
 0xbe2   : > { %1888 = vrot.lane.b32.xlu2 %v3921_v4, %s4201_s1  ;;  %s4205_s1 = sld [smem:[#allocation20_spill]] }
 0xbe6   : > { %v1891_v12 = vpop.permute.xlu0 %1890  ;;  %v3388_v16 = vpop.eup %3387 }
 0xbe7   : > { %v1900_v13 = vsel %vm1089_vm3, %v1891_v12, 0  ;;  %v1983_v17 = vsel %vm1852_vm7, %v3388_v16, 0.0  ;;  %v3390_v22 = vpop.eup %3389 }
 0xbe8   : > { %1908 = vmatpush.bf16.msrb.mxu2 %v1900_v13  ;;  %1875 = vadd.xlane.f32.xlu1 %v1874_v14  ;;  %v1877_v23 = vsel %vm1852_vm7, %v3390_v22, 0.0  ;;  %v3250_v35 = vld [vmem:[%s4205_s1 + $0x20] sm:$0xff] }
 0xbf0   : > { %1984 = vadd.xlane.f32.xlu1 %v1983_v17 }
 0xc09   : > { %1997 = vrot.lane.b32.xlu1 %v3921_v4, %s4202_s10  ;;  %s4206_s10 = sld [smem:[#allocation18_spill]] }
 0xc0b   : > { %1878 = vadd.xlane.f32.xlu2 %v1877_v23 }
 0xc11   : > { %v1970_v24 = vpop.xlane.xlu0 %1969 }
 0xc12   : > { %v1973_v25 = vsub.f32 %v1959_v48, %v1970_v24 }
 0xc14   : > { %v1978_v26 = vmul.f32 1.442695, %v1973_v25 }
 0xc16   : > { %3391 = vpow2.f32 %v1978_v26 }
 0xc1c   : > { %v3392_v27 = vpop.eup %3391 }
 0xc1d   : > { %v1986_v28 = vsel %vm1852_vm7, %v3392_v27, 0.0 }
 0xc1e   : > { %1987 = vadd.xlane.f32.xlu0 %v1986_v28 }
 0xc24   : > { %v2000_v30 = vpop.permute.xlu0 %1999 }
 0xc25   : > { %v2009_v32 = vsel %vm1089_vm3, %v2000_v30, 0 }
 0xc26   : > { %2017 = vmatpush.bf16.msrb.mxu0 %v2009_v32 }
 0xc3d   : > { %v1873_v33 = vpop.xlane.xlu2 %1872 }
 0xc3e   : > { %3393 = vrcp.f32 %v1873_v33 }
 0xc44   : > { %v3394_v38 = vpop.eup %3393 }
 0xc45   : > { %v1889_v34 = vpop.permute.xlu2 %1888  ;;  %v1883_v40 = vmul.f32 %v3394_v38, %v3382_v56 }
 0xc46   : > { %1909 = vmatpush.bf16.msrb.mxu2 %v1889_v34 }
 0xc4a   : > { %2082 = vmatpush.bf16.msra.mxu2 %v3244_v0 }
 0xc53   : > { %v1982_v36 = vpop.xlane.xlu1 %1981 }
 0xc5b   : > { %v1876_v4 = vpop.xlane.xlu1 %1875 }
 0xc5c   : > { %3395 = vrcp.f32 %v1876_v4 }
 0xc62   : > { %v3396_v39 = vpop.eup %3395 }
 0xc63   : > { %v1884_v7 = vmul.f32 %v3396_v39, %v3386_v11  ;;  %v1985_v45 = vpop.xlane.xlu1 %1984 }
 0xc64   : > { %3397 = vrcp.f32 %v1985_v45 }
 0xc65   : > { %v1886_v44 = vpack.c.bf16 %v1884_v7, %v1883_v40  ;;  %3399 = vrcp.f32 %v1982_v36 }
 0xc67   : > { %3068 = vmatmul.msk.bf16.vlgmr.msrb.gmra.mxu2 %vm1852_vm7, %v1886_v44 }
 0xc6a   : > { %v3398_v46 = vpop.eup %3397 }
 0xc6b   : > { %v3400_v47 = vpop.eup %3399  ;;  %v1993_v41 = vmul.f32 %v3398_v46, %v3388_v16 }
 0xc6c   : > { %v1992_v48 = vmul.f32 %v3400_v47, %v3384_v5 }
 0xc6e   : > { %v1995_v50 = vpack.c.bf16 %v1993_v41, %v1992_v48 }
 0xc7b   : > { %v1998_v49 = vpop.permute.xlu1 %1997 }
 0xc7c   : > { %2018 = vmatpush.bf16.msrb.mxu0 %v1998_v49 }
 0xc7e   : > { %v1879_v51 = vpop.xlane.xlu2 %1878 }
 0xc7f   : > { %3401 = vrcp.f32 %v1879_v51  ;;  %3072 = vmatmul.msk.bf16.vlgmr.msrb.gmra.mxu0 %vm1852_vm7, %v1995_v50 }
 0xc85   : > { %v3402_v31 = vpop.eup %3401 }
 0xc86   : > { %v1885_v56 = vmul.f32 %v3402_v31, %v3390_v22 }
 0xc88   : > { %v1887_v57 = vpack.c.bf16 %v1885_v56, %v1885_v56 }
 0xc8a   : > { %3069 = vmatmul.msk.bf16.gmra.mxu2 %vm1852_vm7, %v1887_v57 }
 0xc91   : > { %v1988_v58 = vpop.xlane.xlu0 %1987 }
 0xc92   : > { %3403 = vrcp.f32 %v1988_v58 }
 0xc98   : > { %v3404_v61 = vpop.eup %3403 }
 0xc99   : > { %v1994_v62 = vmul.f32 %v3404_v61, %v3392_v27 }
 0xc9b   : > { %v1996_v63 = vpack.c.bf16 %v1994_v62, %v1994_v62 }
 0xc9d   : > { %3073 = vmatmul.msk.bf16.gmra.mxu0 %vm1852_vm7, %v1996_v63 }
 0xcea   : > { %v1911_v3 = vpop.f32.mrf.mxu2 }
 0xcf2   : > { %v1913_v5 = vpop.f32.mrf.mxu2 }
 0xcf3   : > { %v1922_v6 = vpack.c.bf16 %v1913_v5, %v1911_v3 }
 0xcf5   : > { %3084 = vmatmul.msk.bf16.vlgmr.msra.gmra.mxu2 %vm1051_vm2, %v1922_v6 }
 0xcfc   : > { %v2020_v2 = vpop.f32.mrf.mxu0 }
 0xd04   : > { %v2022_v9 = vpop.f32.mrf.mxu0 }
 0xd05   : > { %v2031_v11 = vpack.c.bf16 %v2022_v9, %v2020_v2  ;;  %v3249_v9 = vld [vmem:[%s4205_s1 + $0x18] sm:$0xff] }
 0xd06   : > { %2305 = vmatpush.bf16.msra.mxu1 %v3249_v9 }
 0xd07   : > { %3078 = vmatmul.msk.bf16.vlgmr.msrb.gmra.mxu1 %vm1051_vm2, %v2031_v11 }
 0xd0d   : > { %v1916_v12 = vpop.f32.mrf.mxu2 }
 0xd0e   : > { %v1923_v13 = vpack.c.bf16 %v1916_v12, %v1916_v12  ;;  %v3248_v12 = vld [vmem:[%s4205_s1 + $0x10] sm:$0xff] }
 0xd0f   : > { %2306 = vmatpush.bf16.msra.mxu1 %v3248_v12 }
 0xd10   : > { %3085 = vmatmul.msk.bf16.gmra.mxu2 %vm1051_vm2, %v1923_v13 }
 0xd15   : > { %v1918_v14 = vpop.f32.mrf.mxu2 }
 0xd1a   : > { %v2025_v16 = vpop.f32.mrf.mxu0 }
 0xd1b   : > { %v2032_v17 = vpack.c.bf16 %v2025_v16, %v2025_v16 }
 0xd1d   : > { %3079 = vmatmul.msk.bf16.gmra.mxu1 %vm1051_vm2, %v2032_v17 }
 0xd22   : > { %v2027_v18 = vpop.f32.mrf.mxu0 }
 0xd78   : > { %v2084_v20 = vpop.f32.mrf.mxu2 }
 0xd80   : > { %v2086_v26 = vpop.f32.mrf.mxu2 }
 0xd84   : > { %v2054_v22 = vpop.f32.mrf.mxu1 }
 0xd85   : > { %v2085_v23 = vadd.f32 %v2084_v20, %v2054_v22 }
 0xd87   : > { %v2097_v24 = vadd.f32 %v3360_v21, %v2085_v23 }
 0xd89   : > { %v2100_v25 = vadd.f32 %v2097_v24, %v3901_v54 }
 0xd8b   : > { %v2105_v27 = vsel %vm986_vm0, %v2100_v25, 0.0 }
 0xd8c   : > { %v2056_v28 = vpop.f32.mrf.mxu1  ;;  %2106 = vadd.xlane.f32.xlu0 %v2105_v27 }
 0xd8d   : > { %v2087_v30 = vadd.f32 %v2086_v26, %v2056_v28 }
 0xd8f   : > { %v2098_v32 = vadd.f32 %v3360_v21, %v2087_v30  ;;  %v3361_v30 = vld [vmem:[%s4206_s10] ss:$0 sm:$0xff]  ;;  %s4208_s10 = sld [smem:[#allocation22_spill]] }
 0xd91   : > { %v2101_v33 = vadd.f32 %v2098_v32, %v3904_v55 }
 0xd93   : > { %v2089_v34 = vpop.f32.mrf.mxu2  ;;  %v2108_v36 = vsel %vm986_vm0, %v2101_v33, 0.0 }
 0xd94   : > { %2109 = vadd.xlane.f32.xlu2 %v2108_v36 }
 0xd9a   : > { %v2059_v4 = vpop.f32.mrf.mxu1 }
 0xd9b   : > { %v2090_v38 = vadd.f32 %v2089_v34, %v2059_v4  ;;  %v2091_v39 = vpop.f32.mrf.mxu2 }
 0xd9d   : > { %v2099_v40 = vadd.f32 %v3360_v21, %v2090_v38  ;;  %v3362_v38 = vld [vmem:[%s4207_s13] ss:$0 sm:$0xff]  ;;  %s4209_s13 = sld [smem:[#allocation21_spill]] }
 0xd9f   : > { %v2102_v7 = vadd.f32 %v2099_v40, %v3915_v60 }
 0xda1   : > { %v2111_v54 = vsel %vm986_vm0, %v2102_v7, 0.0 }
 0xda2   : > { %v2061_v44 = vpop.f32.mrf.mxu1  ;;  %2112 = vadd.xlane.f32.xlu1 %v2111_v54 }
 0xdff   : > { %v2107_v48 = vpop.xlane.xlu0 %2106 }
 0xe00   : > { %v2114_v51 = vmul.f32 %v2107_v48, %v3789_v19 }
 0xe02   : > { %v2117_v56 = vsub.f32 %v2100_v25, %v2114_v51 }
 0xe04   : > { %v2120_v58 = vmul.f32 %v2117_v56, %v2117_v56 }
 0xe06   : > { %v2123_v61 = vsel %vm986_vm0, %v2120_v58, 0.0  ;;  %v2193_v58 = vadd.s32 1, %v3880_v37  ;;  %v3247_v37 = vld [vmem:[%s4205_s1 + $0x8] sm:$0xff] }
 0xe07   : > { %v2110_v45 = vpop.xlane.xlu2 %2109  ;;  %2341 = vmatpush.bf16.msrb.mxu2 %v3247_v37 }
 0xe08   : > { %v2115_v46 = vmul.f32 %v2110_v45, %v3789_v19  ;;  %vm2195_vm6 = vcmp.eq.s32.totalorder %v2193_v58, %v3752_v8  ;;  %v3254_v58 = vld [vmem:[%s4208_s10 + $0x10] sm:$0xff] }
 0xe0a   : > { %v2118_v47 = vsub.f32 %v2101_v33, %v2115_v46 }
 0xe0c   : > { %v2121_v41 = vmul.f32 %v2118_v47, %v2118_v47 }
 0xe0e   : > { %v2126_v55 = vsel %vm986_vm0, %v2121_v41, 0.0 }
 0xe0f   : > { %2127 = vadd.xlane.f32.xlu0 %v2126_v55 }
 0xe15   : > { %v2113_v49 = vpop.xlane.xlu1 %2112 }
 0xe16   : > { %v2116_v50 = vmul.f32 %v2113_v49, %v3789_v19 }
 0xe18   : > { %v2119_v31 = vsub.f32 %v2102_v7, %v2116_v50 }
 0xe1a   : > { %v2122_v60 = vmul.f32 %v2119_v31, %v2119_v31 }
 0xe1c   : > { %v2129_v57 = vsel %vm986_vm0, %v2122_v60, 0.0 }
 0xe1d   : > { %2130 = vadd.xlane.f32.xlu2 %v2129_v57 }
 0xe25   : > { %2124 = vadd.xlane.f32.xlu2 %v2123_v61  ;;  %v4035_v61 = vsel %vm2195_vm6, 1.0, %v3513_v10 }
 0xe82   : > { %v2128_v62 = vpop.xlane.xlu0 %2127 }
 0xe83   : > { %v2133_v63 = vmul.f32 %v2128_v62, %v3789_v19 }
 0xe85   : > { %v2136_v0 = vadd.f32 1e-05, %v2133_v63  ;;  %v3251_v63 = vld [vmem:[%s4205_s1 + $0x28] sm:$0xff] }
 0xe87   : > { %3405 = vrsqrt.f32 %v2136_v0  ;;  %vm2154_vm3 = vweird.f32 %v2136_v0 }
 0xe8d   : > { %v3406_v1 = vpop.eup %3405 }
 0xe8e   : > { %v2149_v3 = vmul.f32 %v3406_v1, %v2136_v0  ;;  %vm2155_vm2 = vweird.f32 %v3406_v1 }
 0xe8f   : > { %vm2156_vm8 = vmor %vm2154_vm3, %vm2155_vm2 }
 0xe90   : > { %v2150_v5 = vmul.f32 %v3406_v1, %v2149_v3  ;;  %v2131_v6 = vpop.xlane.xlu2 %2130 }
 0xe91   : > { %v2134_v2 = vmul.f32 %v2131_v6, %v3789_v19 }
 0xe92   : > { %v2151_v13 = vmul.f32 0.5, %v2150_v5 }
 0xe93   : > { %v2137_v11 = vadd.f32 1e-05, %v2134_v2 }
 0xe94   : > { %v2152_v14 = vsub.f32 1.5, %v2151_v13 }
 0xe95   : > { %3407 = vrsqrt.f32 %v2137_v11  ;;  %vm2164_vm10 = vweird.f32 %v2137_v11 }
 0xe96   : > { %v2153_v21 = vmul.f32 %v3406_v1, %v2152_v14 }
 0xe98   : > { %v2125_v16 = vpop.xlane.xlu2 %2124  ;;  %v2157_v24 = vsel %vm2156_vm8, %v3406_v1, %v2153_v21  ;;  %v3257_v21 = vld [vmem:[%s4208_s10 + $0x28] sm:$0xff] }
 0xe99   : > { %v2132_v17 = vmul.f32 %v2125_v16, %v3789_v19  ;;  %v2169_v28 = vmul.f32 %v2157_v24, %v2118_v47 }
 0xe9b   : > { %v3408_v18 = vpop.eup %3407  ;;  %v2135_v20 = vadd.f32 1e-05, %v2132_v17  ;;  %v2175_v39 = vmul.f32 %v3361_v30, %v2169_v28  ;;  %v3363_v28 = vld [vmem:[%s4209_s13] ss:$0 sm:$0xff]  ;;  %s4210_s13 = sld [smem:[#allocation23_spill]] }
 0xe9c   : > { %v2159_v22 = vmul.f32 %v3408_v18, %v2137_v11  ;;  %vm2165_vm9 = vweird.f32 %v3408_v18 }
 0xe9d   : > { %3409 = vrsqrt.f32 %v2135_v20  ;;  %vm2166_vm12 = vmor %vm2164_vm10, %vm2165_vm9  ;;  %v3998_v45 = vadd.f32 %v3362_v38, %v2175_v39  ;;  %vm2144_vm14 = vweird.f32 %v2135_v20 }
 0xe9e   : > { %v2160_v23 = vmul.f32 %v3408_v18, %v2159_v22  ;;  %v3256_v22 = vld [vmem:[%s4208_s10 + $0x20] sm:$0xff] }
 0xe9f   : > { %v2184_v48 = vmul.f32 %v3898_v53, %v3998_v45 }
 0xea0   : > { %v2161_v25 = vmul.f32 0.5, %v2160_v23 }
 0xea2   : > { %v2162_v26 = vsub.f32 1.5, %v2161_v25 }
 0xea3   : > { %v3410_v27 = vpop.eup %3409 }
 0xea4   : > { %v2163_v32 = vmul.f32 %v3408_v18, %v2162_v26  ;;  %v2139_v33 = vmul.f32 %v3410_v27, %v2135_v20  ;;  %vm2145_vm13 = vweird.f32 %v3410_v27  ;;  %v3258_v20 = vld [vmem:[%s4208_s10 + $0x30] sm:$0xff] }
 0xea5   : > { %vm2146_vm15 = vmor %vm2144_vm14, %vm2145_vm13 }
 0xea6   : > { %v2167_v34 = vsel %vm2166_vm12, %v3408_v18, %v2163_v32  ;;  %v2140_v36 = vmul.f32 %v3410_v27, %v2139_v33  ;;  %v3259_v18 = vld [vmem:[%s4208_s10 + $0x38] sm:$0xff] }
 0xea7   : > { %v2170_v4 = vmul.f32 %v2167_v34, %v2119_v31  ;;  %v2192_v31 = vadd.s32 1, %v3873_v29  ;;  %v4032_v29 = vsel %vm2187_vm4, 1.0, %v3513_v10 }
 0xea8   : > { %v2141_v40 = vmul.f32 0.5, %v2140_v36 }
 0xea9   : > { %v2176_v7 = vmul.f32 %v3361_v30, %v2170_v4  ;;  %vm2194_vm5 = vcmp.eq.s32.totalorder %v2192_v31, %v3752_v8  ;;  %v3246_v8 = vld [vmem:[%s4205_s1] sm:$0xff] }
 0xeaa   : > { %v2142_v54 = vsub.f32 1.5, %v2141_v40  ;;  %v4021_v57 = vsel %vm2194_vm5, 1.0, %v3513_v10  ;;  %2342 = vmatpush.bf16.msrb.mxu2 %v3246_v8 }
 0xeab   : > { %v3996_v44 = vadd.f32 %v3362_v38, %v2176_v7 }
 0xeac   : > { %v2143_v46 = vmul.f32 %v3410_v27, %v2142_v54 }
 0xead   : > { %v2185_v47 = vmul.f32 %v3912_v59, %v3996_v44 }
 0xeae   : > { %v2147_v41 = vsel %vm2146_vm15, %v3410_v27, %v2143_v46  ;;  %2519 = vmatpush.bf16.msra.mxu2 %v3259_v18 }
 0xeaf   : > { %v2168_v55 = vmul.f32 %v2147_v41, %v2117_v56  ;;  %2221 = vmatpush.msrb.mxu3 %v2185_v47  ;;  %2255 = vmatpush.msra.mxu0 %v2185_v47  ;;  %v4018_v56 = vsel %vm2186_vm1, 1.0, %v3513_v10  ;;  %v2280_v62 = vpack.c.bf16 %v2185_v47, %v2185_v47 }
 0xeb1   : > { %2222 = vmatpush.msrb.mxu3 %v2184_v48  ;;  %2256 = vmatpush.msra.mxu0 %v2184_v48  ;;  %v2174_v49 = vmul.f32 %v3361_v30, %v2168_v55 }
 0xeb2   : > { %2520 = vmatpush.bf16.msra.mxu2 %v3258_v20 }
 0xeb3   : > { %v4004_v50 = vadd.f32 %v3362_v38, %v2174_v49 }
 0xeb5   : > { %v2183_v51 = vmul.f32 %v3895_v52, %v4004_v50 }
 0xeb6   : > { %2521 = vmatpush.bf16.msra.mxu2 %v3257_v21 }
 0xeb7   : > { %2223 = vmatpush.msrb.mxu3 %v2183_v51  ;;  %v2279_v60 = vpack.c.bf16 %v2184_v48, %v2183_v51  ;;  %2257 = vmatpush.msra.mxu0 %v2183_v51 }
 0xeb8   : > { %3090 = vmatmul.msk.f32.vlgmr.msrb.gmra.mxu3 %vm1852_vm7, %v3810_v42  ;;  %3093 = vmatmul.msk.f32.vlgmr.msra.gmra.mxu0 %vm1852_vm7, %v3813_v43 }
 0xeb9   : > { %3108 = vmatmul.msk.bf16.vlgmr.msra.gmra.mxu1 %vm986_vm0, %v2279_v60  ;;  %2384 = vmatpush.bf16.msra.mxu3 %v3251_v63  ;;  %v3261_v63 = vld [vmem:[%s4208_s10 + $0x48] sm:$0xff] }
 0xeba   : > { %2522 = vmatpush.bf16.msra.mxu2 %v3256_v22 }
 0xebd   : > { %2385 = vmatpush.bf16.msra.mxu3 %v3250_v35  ;;  %v3260_v35 = vld [vmem:[%s4208_s10 + $0x40] sm:$0xff] }
 0xec0   : > { %3091 = vmatmul.msk.f32.gmra.mxu3 %vm1852_vm7, %v4018_v56  ;;  %3094 = vmatmul.msk.f32.gmra.mxu0 %vm1852_vm7, %v4021_v57 }
 0xec8   : > { %3092 = vmatmul.msk.f32.gmra.mxu3 %vm1852_vm7, %v4032_v29  ;;  %3095 = vmatmul.msk.f32.gmra.mxu0 %vm1852_vm7, %v4035_v61 }
 0xec9   : > { %3109 = vmatmul.msk.bf16.gmra.mxu1 %vm986_vm0, %v2280_v62  ;;  %v3262_v62 = vld [vmem:[%s4208_s10 + $0x50] sm:$0xff] }
 0xf35   : > { %v2259_v0 = vpop.f32.mrf.mxu0 }
 0xf36   : > { %v2308_v10 = vpop.f32.mrf.mxu1 }
 0xf3b   : > { %v2225_v1 = vpop.f32.mrf.mxu3 }
 0xf3d   : > { %v2262_v3 = vpop.f32.mrf.mxu0 }
 0xf3e   : > { %v2358_v5 = vpack.c.bf16 %v2262_v3, %v2259_v0  ;;  %v2310_v6 = vpop.f32.mrf.mxu1 }
 0xf40   : > { %3132 = vmatmul.msk.bf16.vlgmr.msra.gmra.mxu3 %vm986_vm0, %v2358_v5 }
 0xf43   : > { %v2228_v2 = vpop.f32.mrf.mxu3 }
 0xf44   : > { %v2272_v9 = vpack.c.bf16 %v2228_v2, %v2225_v1 }
 0xf45   : > { %v2265_v12 = vpop.f32.mrf.mxu0 }
 0xf46   : > { %v2313_v11 = vpop.f32.mrf.mxu1  ;;  %3118 = vmatmul.msk.bf16.vlgmr.msrb.gmra.mxu2 %vm986_vm0, %v2272_v9  ;;  %v2359_v13 = vpack.c.bf16 %v2265_v12, %v2265_v12 }
 0xf4b   : > { %v2231_v16 = vpop.f32.mrf.mxu3 }
 0xf4c   : > { %v2273_v17 = vpack.c.bf16 %v2231_v16, %v2231_v16 }
 0xf4e   : > { %v2315_v14 = vpop.f32.mrf.mxu1 }
 0xf50   : > { %3133 = vmatmul.msk.bf16.gmra.mxu3 %vm986_vm0, %v2359_v13 }
 0xf56   : > { %3119 = vmatmul.msk.bf16.gmra.mxu2 %vm986_vm0, %v2273_v17  ;;  %v3364_v17 = vld [vmem:[%s4210_s13] ss:$0 sm:$0xff]  ;;  %s4211_s13 = sld [smem:[#allocation24_spill]] }
 0xfc3   : > { %v2387_v23 = vpop.f32.mrf.mxu3 }
 0xfc9   : > { %v2344_v24 = vpop.f32.mrf.mxu2 }
 0xfca   : > { %v2345_v25 = vadd.f32 %v2344_v24, %v2308_v10 }
 0xfcb   : > { %v2389_v26 = vpop.f32.mrf.mxu3 }
 0xfcc   : > { %v2396_v27 = vadd.f32 %v2387_v23, %v2345_v25 }
 0xfce   : > { %v2403_v32 = vadd.f32 %v3363_v28, %v2396_v27 }
 0xfd0   : > { %v2406_v4 = vmax.f32 %v2403_v32, 0.0 }
 0xfd1   : > { %v2346_v30 = vpop.f32.mrf.mxu2 }
 0xfd2   : > { %v2347_v33 = vadd.f32 %v2346_v30, %v2310_v6  ;;  %v2409_v7 = vmul.f32 %v3895_v52, %v2406_v4 }
 0xfd3   : > { %v2392_v34 = vpop.f32.mrf.mxu3 }
 0xfd4   : > { %v2397_v36 = vadd.f32 %v2389_v26, %v2347_v33 }
 0xfd6   : > { %v2404_v38 = vadd.f32 %v3363_v28, %v2397_v36 }
 0xfd8   : > { %v2407_v39 = vmax.f32 %v2404_v38, 0.0 }
 0xfd9   : > { %v2349_v40 = vpop.f32.mrf.mxu2 }
 0xfda   : > { %v2410_v54 = vmul.f32 %v3898_v53, %v2407_v39  ;;  %v2350_v46 = vadd.f32 %v2349_v40, %v2313_v11 }
 0xfdb   : > { %v2394_v47 = vpop.f32.mrf.mxu3 }
 0xfdc   : > { %v2483_v41 = vpack.c.bf16 %v2410_v54, %v2409_v7  ;;  %v2398_v55 = vadd.f32 %v2392_v34, %v2350_v46 }
 0xfde   : > { %v2405_v48 = vadd.f32 %v3363_v28, %v2398_v55  ;;  %3164 = vmatmul.msk.bf16.vlgmr.msra.gmra.mxu2 %vm1504_vm11, %v2483_v41 }
 0xfe0   : > { %v2408_v49 = vmax.f32 %v2405_v48, 0.0 }
 0xfe1   : > { %v2351_v51 = vpop.f32.mrf.mxu2 }
 0xfe2   : > { %v2411_v31 = vmul.f32 %v3912_v59, %v2408_v49 }
 0xfe4   : > { %2425 = vmatpush.msrb.mxu0 %v2411_v31  ;;  %2451 = vmatpush.msrb.mxu1 %v2411_v31  ;;  %v2484_v60 = vpack.c.bf16 %v2411_v31, %v2411_v31 }
 0xfe6   : > { %2426 = vmatpush.msrb.mxu0 %v2410_v54  ;;  %2452 = vmatpush.msrb.mxu1 %v2410_v54 }
 0xfe8   : > { %2427 = vmatpush.msrb.mxu0 %v2409_v7  ;;  %2453 = vmatpush.msrb.mxu1 %v2409_v7 }
 0xfe9   : > { %3134 = vmatmul.msk.f32.vlgmr.msrb.gmra.mxu0 %vm1852_vm7, %v3810_v42  ;;  %3137 = vmatmul.msk.f32.vlgmr.msrb.gmra.mxu1 %vm1852_vm7, %v3813_v43  ;;  %v3255_v42 = vld [vmem:[%s4208_s10 + $0x18] sm:$0xff] }
 0xfea   : > { %v3263_v43 = vld [vmem:[%s4208_s10 + $0x58] sm:$0xff]  ;;  %2567 = vmatpush.bf16.msrb.mxu3 %v3255_v42 }
 0xfeb   : > { %2626 = vmatpush.bf16.msra.mxu0 %v3263_v43 }
 0xfee   : > { %3165 = vmatmul.msk.bf16.gmra.mxu2 %vm1504_vm11, %v2484_v60  ;;  %2568 = vmatpush.bf16.msrb.mxu3 %v3254_v58  ;;  %v2740_v58 = vld [vmem:[%s3680_s21] sm:$0xff] }
 0xfef   : > { %2627 = vmatpush.bf16.msra.mxu0 %v3262_v62 }
 0xff1   : > { %3135 = vmatmul.msk.f32.gmra.mxu0 %vm1852_vm7, %v4018_v56  ;;  %3138 = vmatmul.msk.f32.gmra.mxu1 %vm1852_vm7, %v4021_v57  ;;  %v3253_v56 = vld [vmem:[%s4208_s10 + $0x8] sm:$0xff]  ;;  %v3252_v57 = vld [vmem:[%s4208_s10] sm:$0xff] }
 0xff2   : > { %2569 = vmatpush.bf16.msrb.mxu3 %v3253_v56 }
 0xff3   : > { %2628 = vmatpush.bf16.msra.mxu0 %v3261_v63 }
 0xff6   : > { %2570 = vmatpush.bf16.msrb.mxu3 %v3252_v57 }
 0xff7   : > { %2629 = vmatpush.bf16.msra.mxu0 %v3260_v35 }
 0xff9   : > { %3136 = vmatmul.msk.f32.gmra.mxu0 %vm1852_vm7, %v4032_v29  ;;  %3139 = vmatmul.msk.f32.gmra.mxu1 %vm1852_vm7, %v4035_v61 }
0x1061   : > { %v2524_v29 = vpop.f32.mrf.mxu2 }
0x1066   : > { %v2429_v37 = vpop.f32.mrf.mxu0  ;;  %v2455_v8 = vpop.f32.mrf.mxu1 }
0x1069   : > { %v2526_v61 = vpop.f32.mrf.mxu2 }
0x106e   : > { %v2432_v0 = vpop.f32.mrf.mxu0  ;;  %v2458_v10 = vpop.f32.mrf.mxu1 }
0x106f   : > { %v2472_v1 = vpack.c.bf16 %v2432_v0, %v2429_v37  ;;  %v2590_v3 = vpack.c.bf16 %v2458_v10, %v2455_v8 }
0x1071   : > { %v2529_v5 = vpop.f32.mrf.mxu2  ;;  %3182 = vmatmul.msk.bf16.vlgmr.msrb.gmra.mxu3 %vm1504_vm11, %v2472_v1  ;;  %3208 = vmatmul.msk.bf16.vlgmr.msra.gmra.mxu0 %vm1504_vm11, %v2590_v3 }
0x1076   : > { %v2435_v2 = vpop.f32.mrf.mxu0  ;;  %v2461_v9 = vpop.f32.mrf.mxu1 }
0x1077   : > { %v2473_v11 = vpack.c.bf16 %v2435_v2, %v2435_v2  ;;  %v2591_v12 = vpack.c.bf16 %v2461_v9, %v2461_v9 }
0x1079   : > { %v2531_v6 = vpop.f32.mrf.mxu2 }
0x1081   : > { %3183 = vmatmul.msk.bf16.gmra.mxu3 %vm1504_vm11, %v2473_v11  ;;  %3209 = vmatmul.msk.bf16.gmra.mxu0 %vm1504_vm11, %v2591_v12 }
0x10ee   : > { %v2631_v13 = vpop.f32.mrf.mxu0 }
0x10f4   : > { %v2572_v14 = vpop.f32.mrf.mxu3 }
0x10f5   : > { %v2573_v16 = vadd.f32 %v2572_v14, %v2524_v29 }
0x10f6   : > { %v2633_v18 = vpop.f32.mrf.mxu0 }
0x10f7   : > { %v2640_v20 = vadd.f32 %v2631_v13, %v2573_v16 }
0x10f9   : > { %v2647_v21 = vadd.f32 %v3364_v17, %v2640_v20  ;;  %v2741_v20 = vld [vmem:[%s3680_s21 + $0x8] sm:$0xff] }
0x10fb   : > { %v2650_v22 = vadd.f32 %v2647_v21, %v4004_v50 }
0x10fc   : > { %v2574_v23 = vpop.f32.mrf.mxu3 }
0x10fd   : > { %v2575_v24 = vadd.f32 %v2574_v23, %v2526_v61  ;;  %v2655_v25 = vsel %vm986_vm0, %v2650_v22, 0.0 }
0x10fe   : > { %2656 = vadd.xlane.f32.xlu1 %v2655_v25  ;;  %v2636_v26 = vpop.f32.mrf.mxu0 }
0x10ff   : > { %v2641_v27 = vadd.f32 %v2633_v18, %v2575_v24 }
0x1101   : > { %v2648_v28 = vadd.f32 %v3364_v17, %v2641_v27 }
0x1103   : > { %v2651_v30 = vadd.f32 %v2648_v28, %v3998_v45 }
0x1104   : > { %v2577_v32 = vpop.f32.mrf.mxu3 }
0x1105   : > { %v2578_v33 = vadd.f32 %v2577_v32, %v2529_v5  ;;  %v2658_v34 = vsel %vm986_vm0, %v2651_v30, 0.0 }
0x1106   : > { %2659 = vadd.xlane.f32.xlu2 %v2658_v34  ;;  %v2638_v36 = vpop.f32.mrf.mxu0 }
0x1107   : > { %v2642_v4 = vadd.f32 %v2636_v26, %v2578_v33  ;;  %v3366_v33 = vld [vmem:[%s3670_s27] ss:$0 sm:$0xff] }
0x1109   : > { %v2649_v38 = vadd.f32 %v3364_v17, %v2642_v4 }
0x110b   : > { %v2652_v50 = vadd.f32 %v2649_v38, %v3996_v44 }
0x110c   : > { %v2579_v39 = vpop.f32.mrf.mxu3 }
0x110d   : > { %v2661_v40 = vsel %vm986_vm0, %v2652_v50, 0.0 }
0x110e   : > { %2662 = vadd.xlane.f32.xlu0 %v2661_v40 }
0x1171   : > { %v2657_v7 = vpop.xlane.xlu1 %2656 }
0x1172   : > { %v2664_v54 = vmul.f32 %v2657_v7, %v3789_v19 }
0x1174   : > { %v4092_v46 = vsub.f32 %v2650_v22, %v2664_v54 }
0x1176   : > { %v2670_v45 = vmul.f32 %v4092_v46, %v4092_v46 }
0x1178   : > { %v2673_v47 = vsel %vm986_vm0, %v2670_v45, 0.0 }
0x1179   : > { %2674 = vadd.xlane.f32.xlu1 %v2673_v47  ;;  %v2660_v41 = vpop.xlane.xlu2 %2659 }
0x117a   : > { %v2665_v55 = vmul.f32 %v2660_v41, %v3789_v19  ;;  %v3264_v41 = vld [vmem:[%s4212_s4] sm:$0xff]  ;;  %s2799_s4 = sshll.u32 %s2796_s6, 4  ;;  %s2800_s4 = int_to_ptr.hbm [resolvable:$true] %s2799_s4 }
0x117b   : > { %s3431_s8 = sshra.s32 %s2800_s4, 4  ;;  %s3432_s8 = int_to_ptr.hbm [resolvable:$true] %s3431_s8 }
0x117c   : > { %v2668_v44 = vsub.f32 %v2651_v30, %v2665_v55  ;;  %v3365_v30 = vld [vmem:[%s4211_s13] ss:$0 sm:$0xff]  ;;  %s960_s13 = sand.u32 1, %s3471_s23   ;;  %p3438_p0 = scmp.lt.s32.totalorder %s3432_s8, %s3685_s20 }
0x117d   : > { %s2909_s1 = sshll.u32 %s960_s13, 4  ;;  %s2785_s0 = scalar_lea.sflag [#allocation3], %s960_s13 }
0x117e   : > { %v2671_v48 = vmul.f32 %v2668_v44, %v2668_v44  ;;  %s962_s5 = scalar_lea.vmem [#allocation2], %s2909_s1  ;;  %s3433_s1 = scalar_lea.hbm %s3432_s8, 16 }
0x117f   : > { %s2797_s7 = sshll.u32 %s962_s5, 4  ;;  %p3434_p11 = scmp.ne.s32.totalorder %s3432_s8, %s3433_s1  ;;  %s2798_s7 = int_to_ptr.vmem [resolvable:$true] %s2797_s7 }
0x1180   : > { %v2676_v49 = vsel %vm986_vm0, %v2671_v48, 0.0  ;;  %p3439_p1 = scmp.lt.s32.totalorder %s3437_s3, %s3433_s1 }
0x1181   : > { %2677 = vadd.xlane.f32.xlu2 %v2676_v49  ;;  %v2663_v51 = vpop.xlane.xlu0 %2662  ;;  %p3435_p12 = pnand %p3434_p11, %p3725_p5 }
0x1182   : > { %v2666_v31 = vmul.f32 %v2663_v51, %v3789_v19  ;;  %p3440_p2 = por %p3439_p1, %p3438_p0 }
0x1183   : > { %p3436_p13 = pneg %p3435_p12 }
0x1184   : > { %v2669_v60 = vsub.f32 %v2652_v50, %v2666_v31 }
0x1185   : > { %p3441_p3 = pnand %p3440_p2, %p3436_p13 }
0x1186   : > { %v2672_v42 = vmul.f32 %v2669_v60, %v2669_v60 }
0x1188   : > { %v2679_v43 = vsel %vm986_vm0, %v2672_v42, 0.0 }
0x1189   : > { %2680 = vadd.xlane.f32.xlu0 %v2679_v43 }
0x1192   : > { %2749 = vperm.xlu1 %3350, %v2741_v20  }
0x119d   : > { %2744 = vperm.xlu0 %3348, %v2740_v58  }
0x11ec   : > { %v2675_v62 = vpop.xlane.xlu1 %2674 }
0x11ed   : > { %v2682_v56 = vmul.f32 %v2675_v62, %v3789_v19 }
0x11ef   : > { %v2685_v63 = vadd.f32 1e-05, %v2682_v56 }
0x11f1   : > { %3411 = vrsqrt.f32 %v2685_v63  ;;  %vm2694_vm9 = vweird.f32 %v2685_v63 }
0x11f4   : > { %v2678_v57 = vpop.xlane.xlu2 %2677 }
0x11f5   : > { %v2683_v35 = vmul.f32 %v2678_v57, %v3789_v19 }
0x11f7   : > { %v2686_v29 = vadd.f32 1e-05, %v2683_v35  ;;  %v3412_v37 = vpop.eup %3411 }
0x11f8   : > { %v2689_v8 = vmul.f32 %v3412_v37, %v2685_v63  ;;  %vm2695_vm2 = vweird.f32 %v3412_v37 }
0x11f9   : > { %3413 = vrsqrt.f32 %v2686_v29  ;;  %vm2704_vm3 = vweird.f32 %v2686_v29  ;;  %vm2696_vm12 = vmor %vm2694_vm9, %vm2695_vm2 }
0x11fa   : > { %v2690_v3 = vmul.f32 %v3412_v37, %v2689_v8 }
0x11fc   : > { %v2681_v61 = vpop.xlane.xlu0 %2680  ;;  %v2691_v2 = vmul.f32 0.5, %v2690_v3 }
0x11fd   : > { %v2684_v0 = vmul.f32 %v2681_v61, %v3789_v19 }
0x11fe   : > { %v2692_v13 = vsub.f32 1.5, %v2691_v2 }
0x11ff   : > { %v3414_v10 = vpop.eup %3413  ;;  %v2687_v1 = vadd.f32 1e-05, %v2684_v0 }
0x1200   : > { %v2699_v5 = vmul.f32 %v3414_v10, %v2686_v29  ;;  %vm2705_vm11 = vweird.f32 %v3414_v10  ;;  %v2693_v18 = vmul.f32 %v3412_v37, %v2692_v13 }
0x1201   : > { %3415 = vrsqrt.f32 %v2687_v1  ;;  %vm2706_vm8 = vmor %vm2704_vm3, %vm2705_vm11  ;;  %vm2714_vm13 = vweird.f32 %v2687_v1 }
0x1202   : > { %v2700_v6 = vmul.f32 %v3414_v10, %v2699_v5  ;;  %v2697_v23 = vsel %vm2696_vm12, %v3412_v37, %v2693_v18 }
0x1203   : > { %v2718_v27 = vmul.f32 %v2697_v23, %v4092_v46 }
0x1204   : > { %v2701_v9 = vmul.f32 0.5, %v2700_v6 }
0x1205   : > { %v2724_v4 = vmul.f32 %v3365_v30, %v2718_v27 }
0x1206   : > { %v2702_v11 = vsub.f32 1.5, %v2701_v9 }
0x1207   : > { %v3416_v12 = vpop.eup %3415  ;;  %v2730_v40 = vadd.f32 %v3366_v33, %v2724_v4 }
0x1208   : > { %v2709_v14 = vmul.f32 %v3416_v12, %v2687_v1  ;;  %v2703_v16 = vmul.f32 %v3414_v10, %v2702_v11  ;;  %vm2715_vm10 = vweird.f32 %v3416_v12 }
0x1209   : > { %vm2716_vm14 = vmor %vm2714_vm13, %vm2715_vm10  ;;  %v2733_v46 = vmul.f32 %v3895_v52, %v2730_v40  ;;  %v2750_v52 = vpop.permute.xlu1 %2749 }
0x120a   : > { %v2710_v17 = vmul.f32 %v3416_v12, %v2709_v14  ;;  %v2707_v21 = vsel %vm2706_vm8, %v3414_v10, %v2703_v16 }
0x120b   : > { %v2719_v25 = vmul.f32 %v2707_v21, %v2668_v44 }
0x120c   : > { %v2711_v19 = vmul.f32 0.5, %v2710_v17 }
0x120d   : > { %v2725_v34 = vmul.f32 %v3365_v30, %v2719_v25 }
0x120e   : > { %v2712_v22 = vsub.f32 1.5, %v2711_v19 }
0x120f   : > { %v2731_v50 = vadd.f32 %v3366_v33, %v2725_v34 }
0x1210   : > { %v2713_v24 = vmul.f32 %v3416_v12, %v2712_v22 }
0x1211   : > { %v2734_v54 = vmul.f32 %v3898_v53, %v2731_v50 }
0x1212   : > { %v2717_v26 = vsel %vm2716_vm14, %v3416_v12, %v2713_v24 }
0x1213   : > { %v2720_v28 = vmul.f32 %v2717_v26, %v2669_v60  ;;  %v2738_v45 = vpack.c.bf16 %v2734_v54, %v2733_v46 }
0x1215   : > { %v2726_v32 = vmul.f32 %v3365_v30, %v2720_v28  ;;  %v2761_v47 = vsel %vm986_vm0, %v2738_v45, 0 }
0x1217   : > { %v2732_v36 = vadd.f32 %v3366_v33, %v2726_v32 }
0x1219   : > { %v2735_v38 = vmul.f32 %v3912_v59, %v2732_v36  ;;  %v2745_v59 = vpop.permute.xlu0 %2744 }
0x121b   : > { %v2739_v39 = vpack.c.bf16 %v2735_v38, %v2735_v38 }
0x121d   : > { %v2764_v7 = vsel %vm986_vm0, %v2739_v39, 0 }
0x121e   : > { %2772 = vmatpush.bf16.xpose.msra.mxu1 %v2764_v7 }
0x1226   : > { %2773 = vmatpush.bf16.xpose.msra.mxu1 %v2761_v47 }
0x122d   : > { %3214 = vmatmul.msk.bf16.vlgmr.msra.gmra.mxu1 %vm986_vm0, %v3264_v41 }
0x12aa   : > { %v2775_v55 = vpop.f32.mrf.mxu1 }
0x12ab   : > { %v2776_v44 = vadd.f32 %v2775_v55, %v2745_v59 }
0x12ad   : > { %v2780_v48 = vmul.f32 %v3943_v15, %v2776_v44 }
0x12af   : > { %2782 = vst.msk [vmem:[%s962_s5] sm:$0xff] %vm1852_vm7, %v2780_v48 }
0x12b2   : > { %v2777_v53 = vpop.f32.mrf.mxu1 }
0x12b3   : > { %v2778_v49 = vadd.f32 %v2777_v53, %v2750_v52 }
0x12b5   : > { %v2781_v51 = vmul.f32 %v3943_v15, %v2778_v49 }
0x12b7   : > { %2783 = vst.msk [vmem:[%s962_s5 + $0x8] sm:$0xff] %vm1852_vm7, %v2781_v51 }
0x12b8   : > { %3444 = shalt.err (!%p3441_p3)
}
0x12b9   : > { %s3520_s6 = smov 128   ;;  %s3521_s9 = smov 8  }
0x12ba   : > { %3268 = dma.vmem_to_hbm [thread:$0]  (%p3725_p5), %s2798_s7, 256, %s2800_s4, %s2785_s0, %s3520_s6, %s3520_s6, %s3521_s9  }
0x12bb PF: > { %p3274_p4 = scmp.ge.s32.totalorder %s3479_s28, 2  ;;  %s2814_s5 = sand.u32 1, %s3467_s22  }
0x12bc   : > { %s2815_s13 = scalar_lea.sflag [#allocation3], %s2814_s5 }
0x12bd   : > { %p3271_p7 = pnand %p3274_p4, %p3729_p6 }
0x12bf   : > { %p3272_p8 = pneg %p3271_p7 }
0x12c1   : > { %3462 = dma.done.wait (%p3272_p8), %s2815_s13, 256  }
0x12c2   : > { %3464 = vsyncadd (%p3272_p8), %s2815_s13, 4294967040  ;;  %p73_p9 = scmp.ge.s32.totalorder %s3712_s2, 4   ;;  %s4213_s22 = smov %s3471_s23 }
0x12c3   : > { %s4214_s23 = smov %s3475_s26  ;;  %s4215_s26 = smov %s3723_s11 }
0x12c4   : > { %s4216_s28 = smov %s3712_s2  ;;  %75 = sbr.rel (!%p73_p9) target bundleno = 64 (0x40), region = 221 }
0x12c9   :  { %2821 = vsyncpa [#allocation3], 1 }
0x12ca   :  { %2823 = vsyncpa [#allocation3 + $0x1], 1 }

</bundles_post_ra>
